<compile_context>
chip_gen: v5e
topology: v5e:2x2
jax: 0.10.0
libtpu: 0.0.40
codegen_flags: <defaults>
</compile_context>

<pallas_src>
import functools

import jax
import jax.numpy as jnp
from jax import lax
from jax.experimental import pallas as pl
from jax.experimental.pallas import tpu as pltpu

_CONV_DTYPE = jnp.bfloat16   # MXU operand dtype; accumulation stays f32.


def _zero_pad_hw1(x):
    """Zero-pad a (H, W, C) value by 1 on both spatial dims (value level)."""
    h, w, c = x.shape
    zr = jnp.zeros((1, w, c), x.dtype)
    x = jnp.concatenate([zr, x, zr], axis=0)           # (h+2, w, c)
    zc = jnp.zeros((h + 2, 1, c), x.dtype)
    return jnp.concatenate([zc, x, zc], axis=1)        # (h+2, w+2, c)


def _conv3x3_khsplit(x_hwc, w_ref, H, W, C):
    """3x3 same-conv of (H, W, C) against weights (3, 3C, C) -> (H*W, C) f32.

    kw taps folded onto the lane axis (K = 3C); the three kh taps are three
    accumulating MXU matmuls over row-offset views of the padded patch matrix
    (offsets are multiples of W)."""
    xpad = _zero_pad_hw1(x_hwc)                                   # (H+2, W+2, C)
    wcols = jnp.concatenate(
        [xpad[:, kw:kw + W, :] for kw in range(3)], axis=-1)      # (H+2, W, 3C)
    patches = wcols.reshape((H + 2) * W, 3 * C)                   # free when W%8==0
    acc = None
    for kh in range(3):
        rows = patches[kh * W:kh * W + H * W]                     # sublane view
        part = jnp.dot(rows, w_ref[kh], preferred_element_type=jnp.float32)
        acc = part if acc is None else acc + part
    return acc


def _basic_block_kernel(x_ref, w1_ref, b1_ref, w2_ref, b2_ref, out_ref,
                        *, H, W, C):
    # x_ref:   (1, H, W, C)  unpadded input, one batch element, f32
    # w*_ref:  (3, 3*C, C)   bf16 weights, kh-major, (kw, cin) contraction rows,
    #                        BN scale pre-folded into the cout columns
    # b*_ref:  (1, C)        folded BN shift, f32
    # out_ref: (1, H, W, C)
    x_f32 = x_ref[0]                                  # (H, W, C) f32 (residual)
    x_cd = x_f32.astype(w1_ref.dtype)

    # ---- conv1 (+ folded bn1 scale), shift, relu ----
    acc1 = _conv3x3_khsplit(x_cd, w1_ref, H, W, C)    # (H*W, C) f32
    mid = jnp.maximum(acc1 + b1_ref[...], 0.0)
    mid_cd = mid.reshape(H, W, C).astype(w2_ref.dtype)

    # ---- conv2 (+ folded bn2 scale), shift, residual (f32 x), relu ----
    acc2 = _conv3x3_khsplit(mid_cd, w2_ref, H, W, C)  # (H*W, C) f32
    out = jnp.maximum(acc2 + b2_ref[...] + x_f32.reshape(H * W, C), 0.0)
    out_ref[...] = out.reshape(1, H, W, C).astype(out_ref.dtype)


@jax.jit
def basic_block_forward(x_nchw, w1, g1, be1, m1, v1, w2, g2, be2, m2, v2,
                        eps=1e-5):
    """Eval-mode BasicBlock forward. x_nchw: (N, C, H, W) f32 -> (N, C, H, W) f32."""
    N, C, H, W = x_nchw.shape

    # Fold BatchNorm (inference mode): scale goes into the weights, shift stays.
    inv1 = g1 / jnp.sqrt(v1 + eps)
    inv2 = g2 / jnp.sqrt(v2 + eps)
    b1 = (be1 - m1 * inv1).reshape(1, C)
    b2 = (be2 - m2 * inv2).reshape(1, C)

    # PyTorch (cout, cin, kh, kw) -> (kh, kw, cin, cout) -> (3, 3*cin, cout),
    # BN scale folded into the cout columns before the bf16 cast.
    def prep_w(w, inv):
        wk = jnp.transpose(w, (2, 3, 1, 0)).reshape(3, 3 * C, C)
        return (wk * inv.reshape(1, 1, C)).astype(_CONV_DTYPE)

    w1_k = prep_w(w1, inv1)
    w2_k = prep_w(w2, inv2)

    # NCHW -> NHWC (no wrapper-side spatial pad; halo is built in-kernel).
    x_nhwc = jnp.transpose(x_nchw, (0, 2, 3, 1))

    kernel = functools.partial(_basic_block_kernel, H=H, W=W, C=C)

    flops = 2 * 2 * N * H * W * (9 * C) * C               # two 3x3 convs
    bytes_accessed = (2 * N * H * W * C * 4                # x in + out (f32)
                      + 2 * 9 * C * C * 2                  # two bf16 weights
                      + 2 * C * 4)                         # BN shifts

    out_nhwc = pl.pallas_call(
        kernel,
        out_shape=jax.ShapeDtypeStruct((N, H, W, C), jnp.float32),
        grid_spec=pltpu.PrefetchScalarGridSpec(
            num_scalar_prefetch=0,
            grid=(N,),
            in_specs=[
                pl.BlockSpec((1, H, W, C), lambda n: (n, 0, 0, 0)),
                pl.BlockSpec((3, 3 * C, C), lambda n: (0, 0, 0)),
                pl.BlockSpec((1, C), lambda n: (0, 0)),
                pl.BlockSpec((3, 3 * C, C), lambda n: (0, 0, 0)),
                pl.BlockSpec((1, C), lambda n: (0, 0)),
            ],
            out_specs=pl.BlockSpec((1, H, W, C), lambda n: (n, 0, 0, 0)),
        ),
        compiler_params=pltpu.CompilerParams(
            dimension_semantics=("parallel",)),
        cost_estimate=pl.CostEstimate(
            flops=flops, transcendentals=0, bytes_accessed=bytes_accessed),
    )(x_nhwc, w1_k, b1, w2_k, b2)

    return jnp.transpose(out_nhwc, (0, 3, 1, 2))


def _reference_forward(x, w1, g1, be1, m1, v1, w2, g2, be2, m2, v2, eps=1e-5):
    """Pure-JAX NCHW reference mirroring the kernel's precision policy
    (BN scale folded into bf16 weights, f32 accumulation / shift / residual)."""
    inv1 = g1 / jnp.sqrt(v1 + eps)
    inv2 = g2 / jnp.sqrt(v2 + eps)
    w1s = (w1 * inv1[:, None, None, None]).astype(_CONV_DTYPE)
    w2s = (w2 * inv2[:, None, None, None]).astype(_CONV_DTYPE)
    b1 = (be1 - m1 * inv1).reshape(1, -1, 1, 1)
    b2 = (be2 - m2 * inv2).reshape(1, -1, 1, 1)
    dn = lax.conv_dimension_numbers(x.shape, w1.shape, ("NCHW", "OIHW", "NCHW"))

    def conv(a, w):
        return lax.conv_general_dilated(
            a.astype(_CONV_DTYPE), w, (1, 1), ((1, 1), (1, 1)),
            dimension_numbers=dn, preferred_element_type=jnp.float32)

    out = jnp.maximum(conv(x, w1s) + b1, 0.0)
    out = conv(out, w2s) + b2 + x
    return jnp.maximum(out, 0.0)


if __name__ == "__main__":
    key = jax.random.PRNGKey(0)
    N, C, H, W = 2, 4, 16, 16   # inplanes == planes, stride=1, no downsample

    ks = jax.random.split(key, 8)
    x = jax.random.normal(ks[0], (N, C, H, W), jnp.float32)

    # conv weights (cout, cin, 3, 3), bias=False
    w1 = jax.random.normal(ks[1], (C, C, 3, 3), jnp.float32) * 0.1
    w2 = jax.random.normal(ks[2], (C, C, 3, 3), jnp.float32) * 0.1

    # BatchNorm params / running stats (deterministic, inference mode)
    g1 = 1.0 + 0.1 * jax.random.normal(ks[3], (C,), jnp.float32)
    be1 = 0.1 * jax.random.normal(ks[4], (C,), jnp.float32)
    m1 = 0.05 * jnp.arange(C, dtype=jnp.float32)
    v1 = 1.0 + 0.1 * jnp.arange(C, dtype=jnp.float32)

    g2 = 1.0 + 0.1 * jax.random.normal(ks[5], (C,), jnp.float32)
    be2 = 0.1 * jax.random.normal(ks[6], (C,), jnp.float32)
    m2 = -0.03 * jnp.arange(C, dtype=jnp.float32)
    v2 = 1.0 + 0.05 * jnp.arange(C, dtype=jnp.float32)

    out = basic_block_forward(x, w1, g1, be1, m1, v1, w2, g2, be2, m2, v2)
    out = jax.block_until_ready(out)

    ref = _reference_forward(x, w1, g1, be1, m1, v1, w2, g2, be2, m2, v2)
    assert out.shape == (N, C, H, W)
    assert jnp.max(jnp.abs(out - ref)) < 2e-3, "mismatch vs reference"

    print("KERNEL_OK")
</pallas_src>

<mosaic_0001>
module attributes {stable_mosaic.version = 11 : i64} {
  func.func @_basic_block_kernel(%arg0: i32, %arg1: memref<1x16x16x4xf32, #tpu.memory_space<vmem>>, %arg2: memref<3x12x4xbf16, #tpu.memory_space<vmem>>, %arg3: memref<1x4xf32, #tpu.memory_space<vmem>>, %arg4: memref<3x12x4xbf16, #tpu.memory_space<vmem>>, %arg5: memref<1x4xf32, #tpu.memory_space<vmem>>, %arg6: memref<1x16x16x4xf32, #tpu.memory_space<vmem>>) attributes {dimension_semantics = [#tpu.dimension_semantics<parallel>], iteration_bounds = array<i64: 2>, scalar_prefetch = 0 : i64, scratch_operands = 0 : i64, tpu.core_type = #tpu.core_type<tc>, window_params = [{transform_indices = @transform_0, window_bounds = array<i64: 1, 16, 16, 4>}, {pipeline_mode = #tpu.pipeline_mode<synchronous>, transform_indices = @transform_1, window_bounds = array<i64: 3, 12, 4>}, {pipeline_mode = #tpu.pipeline_mode<synchronous>, transform_indices = @transform_2, window_bounds = array<i64: 1, 4>}, {pipeline_mode = #tpu.pipeline_mode<synchronous>, transform_indices = @transform_3, window_bounds = array<i64: 3, 12, 4>}, {pipeline_mode = #tpu.pipeline_mode<synchronous>, transform_indices = @transform_4, window_bounds = array<i64: 1, 4>}, {transform_indices = @transform_5, window_bounds = array<i64: 1, 16, 16, 4>}]} {
    %c0 = arith.constant 0 : index
    %c0_0 = arith.constant 0 : index
    %c0_1 = arith.constant 0 : index
    %c0_2 = arith.constant 0 : index
    %0 = vector.load %arg1[%c0, %c0_0, %c0_1, %c0_2] : memref<1x16x16x4xf32, #tpu.memory_space<vmem>>, vector<1x16x16x4xf32>
    %1 = vector.shape_cast %0 : vector<1x16x16x4xf32> to vector<16x16x4xf32>
    %2 = arith.truncf %1 : vector<16x16x4xf32> to vector<16x16x4xbf16>
    %cst = arith.constant 0.000000e+00 : bf16
    %3 = vector.broadcast %cst : bf16 to vector<1x16x4xbf16>
    %4 = tpu.concatenate %3, %2, %3 in 0 : vector<1x16x4xbf16>, vector<16x16x4xbf16>, vector<1x16x4xbf16> -> vector<18x16x4xbf16>
    %cst_3 = arith.constant 0.000000e+00 : bf16
    %5 = vector.broadcast %cst_3 : bf16 to vector<18x1x4xbf16>
    %6 = tpu.concatenate %5, %4, %5 in 1 : vector<18x1x4xbf16>, vector<18x16x4xbf16>, vector<18x1x4xbf16> -> vector<18x18x4xbf16>
    %7 = vector.extract_strided_slice %6 {offsets = [0, 0, 0], sizes = [18, 16, 4], strides = [1, 1, 1]} : vector<18x18x4xbf16> to vector<18x16x4xbf16>
    %8 = vector.extract_strided_slice %6 {offsets = [0, 1, 0], sizes = [18, 16, 4], strides = [1, 1, 1]} : vector<18x18x4xbf16> to vector<18x16x4xbf16>
    %9 = vector.extract_strided_slice %6 {offsets = [0, 2, 0], sizes = [18, 16, 4], strides = [1, 1, 1]} : vector<18x18x4xbf16> to vector<18x16x4xbf16>
    %10 = tpu.concatenate %7, %8, %9 in 2 : vector<18x16x4xbf16>, vector<18x16x4xbf16>, vector<18x16x4xbf16> -> vector<18x16x12xbf16>
    %11 = vector.shape_cast %10 : vector<18x16x12xbf16> to vector<288x12xbf16>
    %12 = vector.extract_strided_slice %11 {offsets = [0, 0], sizes = [256, 12], strides = [1, 1]} : vector<288x12xbf16> to vector<256x12xbf16>
    %c0_4 = arith.constant 0 : index
    %c0_5 = arith.constant 0 : index
    %c0_6 = arith.constant 0 : index
    %13 = vector.load %arg2[%c0_4, %c0_5, %c0_6] : memref<3x12x4xbf16, #tpu.memory_space<vmem>>, vector<1x12x4xbf16>
    %14 = vector.shape_cast %13 : vector<1x12x4xbf16> to vector<12x4xbf16>
    %cst_7 = arith.constant dense<0.000000e+00> : vector<256x4xf32>
    %15 = tpu.matmul %12, %14, %cst_7 {dimension_numbers = #tpu.dot_dimension_numbers<[1], [0], [0], [1], [0, 0, 1, 1], [], []>} : vector<256x12xbf16>, vector<12x4xbf16>, vector<256x4xf32> -> vector<256x4xf32>
    %16 = vector.extract_strided_slice %11 {offsets = [16, 0], sizes = [256, 12], strides = [1, 1]} : vector<288x12xbf16> to vector<256x12xbf16>
    %c1 = arith.constant 1 : index
    %c0_8 = arith.constant 0 : index
    %c0_9 = arith.constant 0 : index
    %17 = vector.load %arg2[%c1, %c0_8, %c0_9] : memref<3x12x4xbf16, #tpu.memory_space<vmem>>, vector<1x12x4xbf16>
    %18 = vector.shape_cast %17 : vector<1x12x4xbf16> to vector<12x4xbf16>
    %cst_10 = arith.constant dense<0.000000e+00> : vector<256x4xf32>
    %19 = tpu.matmul %16, %18, %cst_10 {dimension_numbers = #tpu.dot_dimension_numbers<[1], [0], [0], [1], [0, 0, 1, 1], [], []>} : vector<256x12xbf16>, vector<12x4xbf16>, vector<256x4xf32> -> vector<256x4xf32>
    %20 = arith.addf %15, %19 : vector<256x4xf32>
    %21 = vector.extract_strided_slice %11 {offsets = [32, 0], sizes = [256, 12], strides = [1, 1]} : vector<288x12xbf16> to vector<256x12xbf16>
    %c2 = arith.constant 2 : index
    %c0_11 = arith.constant 0 : index
    %c0_12 = arith.constant 0 : index
    %22 = vector.load %arg2[%c2, %c0_11, %c0_12] : memref<3x12x4xbf16, #tpu.memory_space<vmem>>, vector<1x12x4xbf16>
    %23 = vector.shape_cast %22 : vector<1x12x4xbf16> to vector<12x4xbf16>
    %cst_13 = arith.constant dense<0.000000e+00> : vector<256x4xf32>
    %24 = tpu.matmul %21, %23, %cst_13 {dimension_numbers = #tpu.dot_dimension_numbers<[1], [0], [0], [1], [0, 0, 1, 1], [], []>} : vector<256x12xbf16>, vector<12x4xbf16>, vector<256x4xf32> -> vector<256x4xf32>
    %25 = arith.addf %20, %24 : vector<256x4xf32>
    %c0_14 = arith.constant 0 : index
    %c0_15 = arith.constant 0 : index
    %26 = vector.load %arg3[%c0_14, %c0_15] : memref<1x4xf32, #tpu.memory_space<vmem>>, vector<1x4xf32>
    %27 = vector.broadcast %26 : vector<1x4xf32> to vector<256x4xf32>
    %28 = arith.addf %25, %27 : vector<256x4xf32>
    %cst_16 = arith.constant 0.000000e+00 : f32
    %29 = vector.broadcast %cst_16 : f32 to vector<256x4xf32>
    %30 = arith.maximumf %28, %29 : vector<256x4xf32>
    %31 = vector.shape_cast %30 : vector<256x4xf32> to vector<16x16x4xf32>
    %32 = arith.truncf %31 : vector<16x16x4xf32> to vector<16x16x4xbf16>
    %cst_17 = arith.constant 0.000000e+00 : bf16
    %33 = vector.broadcast %cst_17 : bf16 to vector<1x16x4xbf16>
    %34 = tpu.concatenate %33, %32, %33 in 0 : vector<1x16x4xbf16>, vector<16x16x4xbf16>, vector<1x16x4xbf16> -> vector<18x16x4xbf16>
    %cst_18 = arith.constant 0.000000e+00 : bf16
    %35 = vector.broadcast %cst_18 : bf16 to vector<18x1x4xbf16>
    %36 = tpu.concatenate %35, %34, %35 in 1 : vector<18x1x4xbf16>, vector<18x16x4xbf16>, vector<18x1x4xbf16> -> vector<18x18x4xbf16>
    %37 = vector.extract_strided_slice %36 {offsets = [0, 0, 0], sizes = [18, 16, 4], strides = [1, 1, 1]} : vector<18x18x4xbf16> to vector<18x16x4xbf16>
    %38 = vector.extract_strided_slice %36 {offsets = [0, 1, 0], sizes = [18, 16, 4], strides = [1, 1, 1]} : vector<18x18x4xbf16> to vector<18x16x4xbf16>
    %39 = vector.extract_strided_slice %36 {offsets = [0, 2, 0], sizes = [18, 16, 4], strides = [1, 1, 1]} : vector<18x18x4xbf16> to vector<18x16x4xbf16>
    %40 = tpu.concatenate %37, %38, %39 in 2 : vector<18x16x4xbf16>, vector<18x16x4xbf16>, vector<18x16x4xbf16> -> vector<18x16x12xbf16>
    %41 = vector.shape_cast %40 : vector<18x16x12xbf16> to vector<288x12xbf16>
    %42 = vector.extract_strided_slice %41 {offsets = [0, 0], sizes = [256, 12], strides = [1, 1]} : vector<288x12xbf16> to vector<256x12xbf16>
    %c0_19 = arith.constant 0 : index
    %c0_20 = arith.constant 0 : index
    %c0_21 = arith.constant 0 : index
    %43 = vector.load %arg4[%c0_19, %c0_20, %c0_21] : memref<3x12x4xbf16, #tpu.memory_space<vmem>>, vector<1x12x4xbf16>
    %44 = vector.shape_cast %43 : vector<1x12x4xbf16> to vector<12x4xbf16>
    %cst_22 = arith.constant dense<0.000000e+00> : vector<256x4xf32>
    %45 = tpu.matmul %42, %44, %cst_22 {dimension_numbers = #tpu.dot_dimension_numbers<[1], [0], [0], [1], [0, 0, 1, 1], [], []>} : vector<256x12xbf16>, vector<12x4xbf16>, vector<256x4xf32> -> vector<256x4xf32>
    %46 = vector.extract_strided_slice %41 {offsets = [16, 0], sizes = [256, 12], strides = [1, 1]} : vector<288x12xbf16> to vector<256x12xbf16>
    %c1_23 = arith.constant 1 : index
    %c0_24 = arith.constant 0 : index
    %c0_25 = arith.constant 0 : index
    %47 = vector.load %arg4[%c1_23, %c0_24, %c0_25] : memref<3x12x4xbf16, #tpu.memory_space<vmem>>, vector<1x12x4xbf16>
    %48 = vector.shape_cast %47 : vector<1x12x4xbf16> to vector<12x4xbf16>
    %cst_26 = arith.constant dense<0.000000e+00> : vector<256x4xf32>
    %49 = tpu.matmul %46, %48, %cst_26 {dimension_numbers = #tpu.dot_dimension_numbers<[1], [0], [0], [1], [0, 0, 1, 1], [], []>} : vector<256x12xbf16>, vector<12x4xbf16>, vector<256x4xf32> -> vector<256x4xf32>
    %50 = arith.addf %45, %49 : vector<256x4xf32>
    %51 = vector.extract_strided_slice %41 {offsets = [32, 0], sizes = [256, 12], strides = [1, 1]} : vector<288x12xbf16> to vector<256x12xbf16>
    %c2_27 = arith.constant 2 : index
    %c0_28 = arith.constant 0 : index
    %c0_29 = arith.constant 0 : index
    %52 = vector.load %arg4[%c2_27, %c0_28, %c0_29] : memref<3x12x4xbf16, #tpu.memory_space<vmem>>, vector<1x12x4xbf16>
    %53 = vector.shape_cast %52 : vector<1x12x4xbf16> to vector<12x4xbf16>
    %cst_30 = arith.constant dense<0.000000e+00> : vector<256x4xf32>
    %54 = tpu.matmul %51, %53, %cst_30 {dimension_numbers = #tpu.dot_dimension_numbers<[1], [0], [0], [1], [0, 0, 1, 1], [], []>} : vector<256x12xbf16>, vector<12x4xbf16>, vector<256x4xf32> -> vector<256x4xf32>
    %55 = arith.addf %50, %54 : vector<256x4xf32>
    %c0_31 = arith.constant 0 : index
    %c0_32 = arith.constant 0 : index
    %56 = vector.load %arg5[%c0_31, %c0_32] : memref<1x4xf32, #tpu.memory_space<vmem>>, vector<1x4xf32>
    %57 = vector.broadcast %56 : vector<1x4xf32> to vector<256x4xf32>
    %58 = arith.addf %55, %57 : vector<256x4xf32>
    %59 = vector.shape_cast %1 : vector<16x16x4xf32> to vector<256x4xf32>
    %60 = arith.addf %58, %59 : vector<256x4xf32>
    %cst_33 = arith.constant 0.000000e+00 : f32
    %61 = vector.broadcast %cst_33 : f32 to vector<256x4xf32>
    %62 = arith.maximumf %60, %61 : vector<256x4xf32>
    %63 = vector.shape_cast %62 : vector<256x4xf32> to vector<1x16x16x4xf32>
    %c0_34 = arith.constant 0 : index
    %c0_35 = arith.constant 0 : index
    %c0_36 = arith.constant 0 : index
    %c0_37 = arith.constant 0 : index
    %64 = vector.load %arg6[%c0_34, %c0_35, %c0_36, %c0_37] : memref<1x16x16x4xf32, #tpu.memory_space<vmem>>, vector<1x16x16x4xf32>
    tpu.vector_store %arg6[%c0_34, %c0_35, %c0_36, %c0_37], %63 {strides = array<i32>} : memref<1x16x16x4xf32, #tpu.memory_space<vmem>>, vector<1x16x16x4xf32>,
    return
  }
  func.func @transform_0(%arg0: i32) -> (i32, i32, i32, i32) {
    %c0_i32 = arith.constant 0 : i32
    %c0_i32_0 = arith.constant 0 : i32
    %c0_i32_1 = arith.constant 0 : i32
    %c0_i32_2 = arith.constant 0 : i32
    return %arg0, %c0_i32, %c0_i32_0, %c0_i32_1 : i32, i32, i32, i32
  }
  func.func @transform_1(%arg0: i32) -> (i32, i32, i32) {
    %c0_i32 = arith.constant 0 : i32
    %c0_i32_0 = arith.constant 0 : i32
    %c0_i32_1 = arith.constant 0 : i32
    %c0_i32_2 = arith.constant 0 : i32
    return %c0_i32, %c0_i32_0, %c0_i32_1 : i32, i32, i32
  }
  func.func @transform_2(%arg0: i32) -> (i32, i32) {
    %c0_i32 = arith.constant 0 : i32
    %c0_i32_0 = arith.constant 0 : i32
    %c0_i32_1 = arith.constant 0 : i32
    return %c0_i32, %c0_i32_0 : i32, i32
  }
  func.func @transform_3(%arg0: i32) -> (i32, i32, i32) {
    %c0_i32 = arith.constant 0 : i32
    %c0_i32_0 = arith.constant 0 : i32
    %c0_i32_1 = arith.constant 0 : i32
    %c0_i32_2 = arith.constant 0 : i32
    return %c0_i32, %c0_i32_0, %c0_i32_1 : i32, i32, i32
  }
  func.func @transform_4(%arg0: i32) -> (i32, i32) {
    %c0_i32 = arith.constant 0 : i32
    %c0_i32_0 = arith.constant 0 : i32
    %c0_i32_1 = arith.constant 0 : i32
    return %c0_i32, %c0_i32_0 : i32, i32
  }
  func.func @transform_5(%arg0: i32) -> (i32, i32, i32, i32) {
    %c0_i32 = arith.constant 0 : i32
    %c0_i32_0 = arith.constant 0 : i32
    %c0_i32_1 = arith.constant 0 : i32
    %c0_i32_2 = arith.constant 0 : i32
    return %arg0, %c0_i32, %c0_i32_0, %c0_i32_1 : i32, i32, i32, i32
  }
}

</mosaic_0001>

<bundles_post_ra>
// kernel: basic_block_forward.1
= control target key start
LH: loop header
LB: loop body
LE: loop exit
PB: predicated region body
PF: predicated region fallthrough
CT: control target
= control target key end

     0   :  { %s2898_s18 = smov 0   ;;  %s3928_s0 = inlined_call_operand.vmem [shape: f32[2,16,16,4], index: 0, kind: input, shape index: {}]   ;;  %s3929_s1 = inlined_call_operand.vmem [shape: bf16[3,12,4], index: 1, kind: input, shape index: {}]   ;;  %s3930_s2 = inlined_call_operand.vmem [shape: f32[1,4], index: 2, kind: input, shape index: {}]   ;;  %s3931_s3 = inlined_call_operand.vmem [shape: bf16[3,12,4], index: 3, kind: input, shape index: {}]   ;;  %s3932_s4 = inlined_call_operand.vmem [shape: f32[1,4], index: 4, kind: input, shape index: {}]   ;;  %s3933_s5 = inlined_call_operand.vmem [shape: f32[2,16,16,4], index: 5, kind: output, shape index: {}]  }
   0x1 LB: > { %s2662_s19 = sadd.s32 4294967295, %s2863_s18   ;;  %p2666_p0 = scmp.ge.s32.totalorder %s2863_s18, 1  ;;  %s2863_s18 = sphi %s2898_s18, %s15_s18  }
   0x2   : > { %p187_p1 = scmp.lt.s32.totalorder %s2863_s18, 3 }
   0x4   : > { %p188_p2 = pnand %p2666_p0, %p187_p1 }
   0x5   : > { %p215_p3 = scmp.lt.s32.totalorder (!%p188_p2), %s2662_s19, 1  ;;  %s2865_s24 = smov (!%p188_p2), 4  }
   0x6   : > { %191 = sbr.rel (%p188_p2) target bundleno = 970 (0x3ca), region = 40  ;;  %s2866_s25 = smov (!%p188_p2), 8  }
   0xb   : > { %s3937_s19 = smov (!%p215_p3, %s2662_s19), 1  ;;  %vm523_vm0 = vcmask 1040384   ;;  %vm524_vm1 = vsmask.f32 256  ;;  %vm560_vm3 = vsmask.f32 7424 }
   0xc   : > { %s2801_s20 = sshll.u32 %s3937_s19, 8  ;;  %vm2927_vm2 = vmand %vm523_vm0, %vm524_vm1  ;;  %vm833_vm4 = vcmask 1046528   ;;  %vm1032_vm5 = vcmask 1045504   ;;  %vm919_vm6 = vcmask 31744   ;;  %vm954_vm7 = vcmask 64512  }
   0xd   : > { %s2914_s23 = scalar_lea.vmem %s3928_s0, %s2801_s20  ;;  %vm999_vm8 = vcmask 97280   ;;  %s3760_s12 = scalar_lea.vmem %s3933_s5, %s2801_s20 }
   0xe   : > { %v242_v0 = vld [vmem:[%s2914_s23 + $0x80] sm:$0xff]  ;;  %v243_v1 = vld [vmem:[%s2914_s23 + $0x88] sm:$0xff]  ;;  %v244_v2 = vld [vmem:[%s2914_s23 + $0x90] sm:$0xff] }
   0xf   : > { %v274_v3 = vpack.c.bf16 %v242_v0, %v242_v0  ;;  %v275_v4 = vpack.c.bf16 %v243_v1, %v243_v1  ;;  %v245_v5 = vld [vmem:[%s2914_s23 + $0x98] sm:$0xff]  ;;  %v276_v6 = vpack.c.bf16 %v244_v2, %v244_v2  ;;  %v248_v7 = vld [vmem:[%s2914_s23 + $0xb0] sm:$0xff]  ;;  %v250_v15 = vld [vmem:[%s2914_s23 + $0xc0] sm:$0xff] }
  0x10   : > { %v249_v8 = vld [vmem:[%s2914_s23 + $0xb8] sm:$0xff]  ;;  %v277_v9 = vpack.c.bf16 %v245_v5, %v245_v5  ;;  %v280_v10 = vpack.c.bf16 %v248_v7, %v248_v7  ;;  %v251_v16 = vld [vmem:[%s2914_s23 + $0xc8] sm:$0xff]  ;;  %v246_v20 = vld [vmem:[%s2914_s23 + $0xa0] sm:$0xff]  ;;  %v282_v25 = vpack.c.bf16 %v250_v15, %v250_v15 }
  0x11   : > { %v281_v11 = vpack.c.bf16 %v249_v8, %v249_v8  ;;  %v338_v12 = vunpack.c.l.b16 %v274_v3  ;;  %v339_v13 = vunpack.c.l.b16 %v275_v4  ;;  %v340_v14 = vunpack.c.l.b16 %v276_v6  ;;  %v247_v21 = vld [vmem:[%s2914_s23 + $0xa8] sm:$0xff]  ;;  %v252_v41 = vld [vmem:[%s2914_s23 + $0xd0] sm:$0xff]  ;;  %v253_v52 = vld [vmem:[%s2914_s23 + $0xd8] sm:$0xff] }
  0x12   : > { %v341_v17 = vunpack.c.l.b16 %v277_v9  ;;  %v344_v18 = vunpack.c.l.b16 %v280_v10  ;;  %v283_v26 = vpack.c.bf16 %v251_v16, %v251_v16  ;;  %v278_v29 = vpack.c.bf16 %v246_v20, %v246_v20  ;;  %v254_v61 = vld [vmem:[%s2914_s23 + $0xe0] sm:$0xff] }
  0x13   : > { %v345_v19 = vunpack.c.l.b16 %v281_v11  ;;  %v362_v22 = vpack.c.b16 %v339_v13, %v338_v12  ;;  %v279_v30 = vpack.c.bf16 %v247_v21, %v247_v21  ;;  %v346_v39 = vunpack.c.l.b16 %v282_v25 }
  0x14   : > { %v363_v23 = vpack.c.b16 %v341_v17, %v340_v14  ;;  %v347_v40 = vunpack.c.l.b16 %v283_v26  ;;  %v342_v44 = vunpack.c.l.b16 %v278_v29  ;;  %v284_v53 = vpack.c.bf16 %v252_v41, %v252_v41  ;;  %v255_v14 = vld [vmem:[%s2914_s23 + $0xe8] sm:$0xff] }
  0x15   : > { %v365_v24 = vpack.c.b16 %v345_v19, %v344_v18  ;;  %v434_v27 = vshrl.u32 %v362_v22, 16  ;;  %v437_v28 = vshll.u32 %v362_v22, 16  ;;  %v343_v45 = vunpack.c.l.b16 %v279_v30 }
  0x16   : > { %v441_v31 = vshrl.u32 %v363_v23, 16  ;;  %v444_v32 = vshll.u32 %v363_v23, 16  ;;  %v366_v57 = vpack.c.b16 %v347_v40, %v346_v39  ;;  %v285_v1 = vpack.c.bf16 %v253_v52, %v253_v52  ;;  %v257_v40 = vld [vmem:[%s2914_s23 + $0xf8] sm:$0xff] }
  0x17   : > { %v455_v33 = vshrl.u32 %v365_v24, 16  ;;  %v436_v34 = vrot.slane %v434_v27, 7  ;;  %v458_v35 = vshll.u32 %v365_v24, 16  ;;  %v364_v60 = vpack.c.b16 %v343_v45, %v342_v44  ;;  %v256_v27 = vld [vmem:[%s2914_s23 + $0xf0] sm:$0xff] }
  0x18   : > { %v443_v37 = vrot.slane %v441_v31, 7  ;;  %v462_v7 = vshrl.u32 %v366_v57, 16  ;;  %v348_v8 = vunpack.c.l.b16 %v284_v53  ;;  %v286_v9 = vpack.c.bf16 %v254_v61, %v254_v61 }
  0x19   : > { %v457_v38 = vrot.slane %v455_v33, 7  ;;  %v439_v42 = vor.u32 %v437_v28, %v436_v34  ;;  %v552_v43 = vsel %vm2927_vm2, %v436_v34, 0  ;;  %v448_v17 = vshrl.u32 %v364_v60, 16 }
  0x1a   : > { %v677_v46 = vshll.u32 %v552_v43, 16  ;;  %v446_v47 = vor.u32 %v444_v32, %v443_v37  ;;  %v553_v48 = vsel %vm2927_vm2, %v443_v37, 0  ;;  %v862_v0 = vrot.slane %v552_v43, 1 }
  0x1b   : > { %v2938_v49 = vsel %vm2927_vm2, 0, %v439_v42  ;;  %v689_v50 = vshll.u32 %v553_v48, 16  ;;  %v460_v51 = vor.u32 %v458_v35, %v457_v38  ;;  %v865_v12 = vrot.slane %v553_v48, 1 }
  0x1c   : > { %v670_v54 = vshrl.u32 %v2938_v49, 16  ;;  %v672_v55 = vshll.u32 %v2938_v49, 16  ;;  %v2945_v56 = vsel %vm2927_vm2, 0, %v446_v47  ;;  %v679_v63 = vrot.slane %v677_v46, 1 }
  0x1d   : > { %v682_v58 = vshrl.u32 %v2945_v56, 16  ;;  %v684_v59 = vshll.u32 %v2945_v56, 16  ;;  %v691_v3 = vrot.slane %v689_v50, 1  ;;  %v861_v4 = vrot.slane %v2938_v49, 1 }
  0x1e   : > { %v674_v62 = vrot.slane %v672_v55, 1  ;;  %v2953_v5 = vsel %vm2927_vm2, 0, %v460_v51  ;;  %v864_v11 = vrot.slane %v2945_v56, 1  ;;  %v555_v13 = vsel %vm2927_vm2, %v457_v38, 0 }
  0x1f   : > { %v686_v2 = vrot.slane %v684_v59, 1  ;;  %v708_v16 = vshll.u32 %v2953_v5, 16  ;;  %v451_v18 = vshll.u32 %v364_v60, 16  ;;  %v863_v20 = vsel %vm833_vm4, %v861_v4, %v862_v0 }
  0x20   : > { %v675_v6 = vor.u32 %v674_v62, %v670_v54  ;;  %v706_v21 = vshrl.u32 %v2953_v5, 16  ;;  %v465_v22 = vshll.u32 %v366_v57, 16  ;;  %v464_v23 = vrot.slane %v462_v7, 7 }
  0x21   : > { %v687_v10 = vor.u32 %v686_v2, %v682_v58  ;;  %v450_v24 = vrot.slane %v448_v17, 7  ;;  %v349_v25 = vunpack.c.l.b16 %v285_v1  ;;  %v287_v26 = vpack.c.bf16 %v255_v14, %v255_v14  ;;  %v229_v14 = vld [vmem:[%s2914_s23 + $0x18] sm:$0xff] }
  0x22   : > { %v680_v15 = vsel %vm560_vm3, %v675_v6, %v679_v63  ;;  %v866_v28 = vsel %vm833_vm4, %v864_v11, %v865_v12  ;;  %v713_v29 = vshll.u32 %v555_v13, 16  ;;  %v870_v30 = vrot.slane %v2953_v5, 1 }
  0x23   : > { %783 = vrot.lane.b32.xlu0 %v680_v15, %s2865_s24  ;;  %v692_v19 = vsel %vm560_vm3, %v687_v10, %v691_v3  ;;  %v350_v31 = vunpack.c.l.b16 %v286_v9  ;;  %v710_v32 = vrot.slane %v708_v16, 1  ;;  %v453_v33 = vor.u32 %v451_v18, %v450_v24  ;;  %v228_v9 = vld [vmem:[%s2914_s23 + $0x10] sm:$0xff] }
  0x24   : > { %785 = vrot.lane.b32.xlu1 %v692_v19, %s2865_s24  ;;  %v2971_v34 = vsel %vm2927_vm2, %v450_v24, 0  ;;  %v367_v35 = vpack.c.b16 %v349_v25, %v348_v8  ;;  %v871_v37 = vrot.slane %v555_v13, 1  ;;  %v351_v39 = vunpack.c.l.b16 %v287_v26 }
  0x25   : > { %v701_v38 = vshll.u32 %v2971_v34, 16  ;;  %v288_v41 = vpack.c.bf16 %v256_v27, %v256_v27  ;;  %v467_v42 = vor.u32 %v465_v22, %v464_v23  ;;  %v2977_v43 = vsel %vm2927_vm2, 0, %v453_v33 }
  0x26   : > { %v469_v44 = vshrl.u32 %v367_v35, 16  ;;  %v472_v45 = vshll.u32 %v367_v35, 16  ;;  %v715_v46 = vrot.slane %v713_v29, 1  ;;  %v694_v47 = vshrl.u32 %v2977_v43, 16 }
  0x27   : > { %v696_v48 = vshll.u32 %v2977_v43, 16  ;;  %v368_v50 = vpack.c.b16 %v351_v39, %v350_v31  ;;  %v711_v51 = vor.u32 %v710_v32, %v706_v21  ;;  %v289_v53 = vpack.c.bf16 %v257_v40, %v257_v40 }
  0x28   : > { %v471_v52 = vrot.slane %v469_v44, 7  ;;  %v352_v54 = vunpack.c.l.b16 %v288_v41  ;;  %v556_v55 = vsel %vm2927_vm2, %v464_v23, 0  ;;  %v703_v58 = vrot.slane %v701_v38, 1  ;;  %v227_v41 = vld [vmem:[%s2914_s23 + $0x8] sm:$0xff] }
  0x29   : > { %v698_v57 = vrot.slane %v696_v48, 1  ;;  %v476_v59 = vshrl.u32 %v368_v50, 16  ;;  %v2987_v60 = vsel %vm2927_vm2, 0, %v467_v42  ;;  %v479_v62 = vshll.u32 %v368_v50, 16 }
  0x2a   : > { %v474_v61 = vor.u32 %v472_v45, %v471_v52  ;;  %v353_v63 = vunpack.c.l.b16 %v289_v53  ;;  %v872_v0 = vsel %vm833_vm4, %v870_v30, %v871_v37  ;;  %v2992_v2 = vsel %vm2927_vm2, %v471_v52, 0  ;;  %v226_v37 = vld [vmem:[%s2914_s23] sm:$0xff] }
  0x2b   : > { %903 = vrot.lane.b32.xlu0 %v863_v20, %s2866_s25  ;;  %v699_v1 = vor.u32 %v698_v57, %v694_v47  ;;  %v478_v3 = vrot.slane %v476_v59, 7  ;;  %v716_v4 = vsel %vm560_vm3, %v711_v51, %v715_v46  ;;  %v874_v6 = vrot.slane %v556_v55, 1 }
  0x2c   : > { %905 = vrot.lane.b32.xlu1 %v866_v28, %s2866_s25  ;;  %v2997_v7 = vsel %vm2927_vm2, 0, %v474_v61  ;;  %v369_v8 = vpack.c.b16 %v353_v63, %v352_v54  ;;  %v873_v10 = vrot.slane %v2987_v60, 1  ;;  %v868_v13 = vrot.slane %v2971_v34, 1 }
  0x2d   : > { %v704_v11 = vsel %vm560_vm3, %v699_v1, %v703_v58  ;;  %v732_v12 = vshll.u32 %v2997_v7, 16  ;;  %v737_v15 = vshll.u32 %v2992_v2, 16  ;;  %v481_v16 = vor.u32 %v479_v62, %v478_v3 }
  0x2e   : > { %787 = vrot.lane.b32.xlu2 %v704_v11, %s2865_s24  ;;  %v867_v17 = vrot.slane %v2977_v43, 1  ;;  %v483_v18 = vshrl.u32 %v369_v8, 16  ;;  %v730_v19 = vshrl.u32 %v2997_v7, 16  ;;  %v720_v21 = vshll.u32 %v2987_v60, 16 }
  0x2f   : > { %v734_v20 = vrot.slane %v732_v12, 1  ;;  %v260_v22 = vpack.c.bf16 %v228_v9, %v228_v9  ;;  %v3012_v23 = vsel %vm2927_vm2, 0, %v481_v16  ;;  %v486_v25 = vshll.u32 %v369_v8, 16 }
  0x30   : > { %v485_v24 = vrot.slane %v483_v18, 7  ;;  %v261_v26 = vpack.c.bf16 %v229_v14, %v229_v14  ;;  %v744_v27 = vshll.u32 %v3012_v23, 16  ;;  %v558_v28 = vsel %vm2927_vm2, %v478_v3, 0  ;;  %v233_v3 = vld [vmem:[%s2914_s23 + $0x38] sm:$0xff] }
  0x31   : > { %v869_v29 = vsel %vm833_vm4, %v867_v17, %v868_v13  ;;  %v718_v30 = vshrl.u32 %v2987_v60, 16  ;;  %v725_v31 = vshll.u32 %v556_v55, 16  ;;  %v735_v32 = vor.u32 %v734_v20, %v730_v19  ;;  %v232_v55 = vld [vmem:[%s2914_s23 + $0x30] sm:$0xff] }
  0x32   : > { %v739_v33 = vrot.slane %v737_v15, 1  ;;  %v722_v34 = vrot.slane %v720_v21, 1  ;;  %v324_v35 = vunpack.c.l.b16 %v260_v22  ;;  %v875_v38 = vsel %vm833_vm4, %v873_v10, %v874_v6 }
  0x33   : > { %789 = vrot.lane.b32.xlu0 %v716_v4, %s2865_s24  ;;  %v488_v39 = vor.u32 %v486_v25, %v485_v24  ;;  %v325_v40 = vunpack.c.l.b16 %v261_v26  ;;  %v742_v42 = vshrl.u32 %v3012_v23, 16  ;;  %v746_v44 = vrot.slane %v744_v27, 1 }
  0x34   : > { %909 = vrot.lane.b32.xlu1 %v872_v0, %s2866_s25  ;;  %v749_v45 = vshll.u32 %v558_v28, 16  ;;  %v880_v46 = vrot.slane %v558_v28, 1  ;;  %v727_v47 = vrot.slane %v725_v31, 1  ;;  %v258_v50 = vpack.c.bf16 %v226_v37, %v226_v37 }
  0x35   : > { %v355_v48 = vpack.c.b16 %v325_v40, %v324_v35  ;;  %v740_v51 = vsel %vm560_vm3, %v735_v32, %v739_v33  ;;  %v879_v52 = vrot.slane %v3012_v23, 1  ;;  %v723_v53 = vor.u32 %v722_v34, %v718_v30 }
  0x36   : > { %907 = vrot.lane.b32.xlu2 %v869_v29, %s2866_s25  ;;  %v259_v54 = vpack.c.bf16 %v227_v41, %v227_v41  ;;  %v3031_v57 = vsel %vm2927_vm2, 0, %v488_v39  ;;  %v559_v58 = vsel %vm2927_vm2, %v485_v24, 0  ;;  %v747_v62 = vor.u32 %v746_v44, %v742_v42  ;;  %v234_v44 = vld [vmem:[%s2914_s23 + $0x40] sm:$0xff] }
  0x37   : > { %v385_v59 = vshrl.u32 %v355_v48, 16  ;;  %v388_v61 = vshll.u32 %v355_v48, 16  ;;  %v751_v63 = vrot.slane %v749_v45, 1  ;;  %v2867_v0 = vmov 0   ;;  %v235_v45 = vld [vmem:[%s2914_s23 + $0x48] sm:$0xff] }
  0x38   : > { %v373_v1 = vrot.slane %v2867_v0, 7  ;;  %v322_v6 = vunpack.c.l.b16 %v258_v50  ;;  %v323_v8 = vunpack.c.l.b16 %v259_v54  ;;  %v264_v9 = vpack.c.bf16 %v232_v55, %v232_v55  ;;  %v238_v55 = vld [vmem:[%s2914_s23 + $0x60] sm:$0xff] }
  0x39   : > { %v387_v4 = vrot.slane %v385_v59, 7  ;;  %v881_v10 = vsel %vm833_vm4, %v879_v52, %v880_v46  ;;  %v882_v11 = vrot.slane %v3031_v57, 1  ;;  %v883_v12 = vrot.slane %v559_v58, 1  ;;  %v230_v0 = vld [vmem:[%s2914_s23 + $0x20] sm:$0xff] }
  0x3a   : > { %v728_v13 = vsel %vm560_vm3, %v723_v53, %v727_v47  ;;  %v354_v16 = vpack.c.b16 %v323_v8, %v322_v6  ;;  %v265_v17 = vpack.c.bf16 %v233_v3, %v233_v3  ;;  %v752_v18 = vsel %vm560_vm3, %v747_v62, %v751_v63  ;;  %v239_v63 = vld [vmem:[%s2914_s23 + $0x68] sm:$0xff] }
  0x3b   : > { %911 = vrot.lane.b32.xlu0 %v875_v38, %s2866_s25  ;;  %v390_v14 = vor.u32 %v388_v61, %v387_v4  ;;  %v3043_v15 = vsel %vm2927_vm2, %v387_v4, 0  ;;  %v3048_v19 = vsel %vm2927_vm2, 0, %v373_v1  ;;  %v876_v20 = vrot.slane %v2997_v7, 1  ;;  %v231_v8 = vld [vmem:[%s2914_s23 + $0x28] sm:$0xff] }
  0x3c   : > { %793 = vrot.lane.b32.xlu1 %v740_v51, %s2865_s24  ;;  %v756_v21 = vshll.u32 %v3031_v57, 16  ;;  %v378_v24 = vshrl.u32 %v354_v16, 16  ;;  %v381_v25 = vshll.u32 %v354_v16, 16  ;;  %v328_v26 = vunpack.c.l.b16 %v264_v9 }
  0x3d   : > { %v3055_v22 = vsel %vm2927_vm2, 0, %v390_v14  ;;  %v593_v29 = vshll.u32 %v3043_v15, 16  ;;  %v877_v30 = vrot.slane %v2992_v2, 1  ;;  %v884_v31 = vsel %vm833_vm4, %v882_v11, %v883_v12 }
  0x3e   : > { %791 = vrot.lane.b32.xlu2 %v728_v13, %s2865_s24  ;;  %v586_v27 = vshrl.u32 %v3055_v22, 16  ;;  %v588_v28 = vshll.u32 %v3055_v22, 16  ;;  %v564_v32 = vshll.u32 %v3048_v19, 16  ;;  %v380_v33 = vrot.slane %v378_v24, 7 }
  0x3f   : > { %v329_v34 = vunpack.c.l.b16 %v265_v17  ;;  %v3066_v37 = vsel %vm2927_vm2, %v373_v1, 0  ;;  %v562_v38 = vshrl.u32 %v3048_v19, 16  ;;  %v761_v39 = vshll.u32 %v559_v58, 16 }
  0x40   : > { %v590_v35 = vrot.slane %v588_v28, 1  ;;  %v383_v2 = vor.u32 %v381_v25, %v380_v33  ;;  %v754_v40 = vshrl.u32 %v3031_v57, 16  ;;  %v758_v41 = vrot.slane %v756_v21, 1 }
  0x41   : > { %v357_v42 = vpack.c.b16 %v329_v34, %v328_v26  ;;  %v595_v47 = vrot.slane %v593_v29, 1  ;;  %v878_v48 = vsel %vm833_vm4, %v876_v20, %v877_v30  ;;  %v3076_v50 = vsel %vm2927_vm2, %v380_v33, 0 }
  0x42   : > { %v591_v46 = vor.u32 %v590_v35, %v586_v27  ;;  %v566_v51 = vrot.slane %v564_v32, 1  ;;  %v569_v52 = vshll.u32 %v3066_v37, 16  ;;  %v3081_v53 = vsel %vm2927_vm2, 0, %v383_v2 }
  0x43   : > { %795 = vrot.lane.b32.xlu0 %v752_v18, %s2865_s24  ;;  %v399_v54 = vshrl.u32 %v357_v42, 16  ;;  %v576_v58 = vshll.u32 %v3081_v53, 16  ;;  %v763_v59 = vrot.slane %v761_v39, 1  ;;  %v266_v61 = vpack.c.bf16 %v234_v44, %v234_v44 }
  0x44   : > { %915 = vrot.lane.b32.xlu1 %v881_v10, %s2866_s25  ;;  %v267_v62 = vpack.c.bf16 %v235_v45, %v235_v45  ;;  %v581_v1 = vshll.u32 %v3076_v50, 16  ;;  %v759_v3 = vor.u32 %v758_v41, %v754_v40  ;;  %v402_v6 = vshll.u32 %v357_v42, 16 }
  0x45   : > { %v401_v4 = vrot.slane %v399_v54, 7  ;;  %v596_v9 = vsel %vm560_vm3, %v591_v46, %v595_v47  ;;  %v574_v10 = vshrl.u32 %v3081_v53, 16  ;;  %v578_v11 = vrot.slane %v576_v58, 1  ;;  %v240_v54 = vld [vmem:[%s2914_s23 + $0x70] sm:$0xff] }
  0x46   : > { %913 = vrot.lane.b32.xlu2 %v878_v48, %s2866_s25  ;;  %v270_v12 = vpack.c.bf16 %v238_v55, %v238_v55  ;;  %v271_v13 = vpack.c.bf16 %v239_v63, %v239_v63  ;;  %v262_v14 = vpack.c.bf16 %v230_v0, %v230_v0  ;;  %v330_v16 = vunpack.c.l.b16 %v266_v61  ;;  %v241_v55 = vld [vmem:[%s2914_s23 + $0x78] sm:$0xff] }
  0x47   : > { %v331_v17 = vunpack.c.l.b16 %v267_v62  ;;  %v263_v18 = vpack.c.bf16 %v231_v8, %v231_v8  ;;  %v567_v20 = vor.u32 %v566_v51, %v562_v38  ;;  %v571_v21 = vrot.slane %v569_v52, 1 }
  0x48   : > { %v404_v24 = vor.u32 %v402_v6, %v401_v4  ;;  %v579_v25 = vor.u32 %v578_v11, %v574_v10  ;;  %v583_v26 = vrot.slane %v581_v1, 1  ;;  %v764_v27 = vsel %vm560_vm3, %v759_v3, %v763_v59 }
  0x49   : > { %v334_v28 = vunpack.c.l.b16 %v270_v12  ;;  %v335_v29 = vunpack.c.l.b16 %v271_v13  ;;  %v326_v30 = vunpack.c.l.b16 %v262_v14  ;;  %v358_v32 = vpack.c.b16 %v331_v17, %v330_v16  ;;  %v236_v16 = vld [vmem:[%s2914_s23 + $0x50] sm:$0xff] }
  0x4a   : > { %v327_v33 = vunpack.c.l.b16 %v263_v18  ;;  %v572_v34 = vsel %vm560_vm3, %v567_v20, %v571_v21  ;;  %v840_v35 = vrot.slane %v3055_v22, 1  ;;  %v584_v38 = vsel %vm560_vm3, %v579_v25, %v583_v26  ;;  %v237_v21 = vld [vmem:[%s2914_s23 + $0x58] sm:$0xff] }
  0x4b   : > { %917 = vrot.lane.b32.xlu0 %v884_v31, %s2866_s25  ;;  %v3099_v31 = vsel %vm2927_vm2, 0, %v404_v24  ;;  %v841_v39 = vrot.slane %v3043_v15, 1  ;;  %v360_v2 = vpack.c.b16 %v335_v29, %v334_v28  ;;  %v837_v41 = vrot.slane %v3081_v53, 1 }
  0x4c   : > { %769 = vrot.lane.b32.xlu1 %v596_v9, %s2865_s24  ;;  %v356_v40 = vpack.c.b16 %v327_v33, %v326_v30  ;;  %v838_v42 = vrot.slane %v3076_v50, 1  ;;  %v3108_v44 = vsel %vm2927_vm2, %v401_v4, 0  ;;  %v612_v45 = vshll.u32 %v3099_v31, 16 }
  0x4d   : > { %v406_v46 = vshrl.u32 %v358_v32, 16  ;;  %v842_v15 = vsel %vm833_vm4, %v840_v35, %v841_v39  ;;  %v420_v51 = vshrl.u32 %v360_v2, 16  ;;  %v610_v58 = vshrl.u32 %v3099_v31, 16 }
  0x4e   : > { %797 = vrot.lane.b32.xlu2 %v764_v27, %s2865_s24  ;;  %v392_v47 = vshrl.u32 %v356_v40, 16  ;;  %v395_v48 = vshll.u32 %v356_v40, 16  ;;  %v839_v50 = vsel %vm833_vm4, %v837_v41, %v838_v42  ;;  %v617_v59 = vshll.u32 %v3108_v44, 16 }
  0x4f   : > { %v409_v61 = vshll.u32 %v358_v32, 16  ;;  %v614_v62 = vrot.slane %v612_v45, 1  ;;  %v408_v63 = vrot.slane %v406_v46, 7  ;;  %v834_v3 = vrot.slane %v3048_v19, 1 }
  0x50   : > { %v394_v52 = vrot.slane %v392_v47, 7  ;;  %v272_v6 = vpack.c.bf16 %v240_v54, %v240_v54  ;;  %v273_v8 = vpack.c.bf16 %v241_v55, %v241_v55  ;;  %v835_v9 = vrot.slane %v3066_v37, 1 }
  0x51   : > { %v422_v10 = vrot.slane %v420_v51, 7  ;;  %v423_v11 = vshll.u32 %v360_v2, 16  ;;  %v615_v17 = vor.u32 %v614_v62, %v610_v58  ;;  %v619_v18 = vrot.slane %v617_v59, 1 }
  0x52   : > { %v397_v0 = vor.u32 %v395_v48, %v394_v52  ;;  %v546_v1 = vsel %vm2927_vm2, %v394_v52, 0  ;;  %v411_v20 = vor.u32 %v409_v61, %v408_v63  ;;  %v336_v37 = vunpack.c.l.b16 %v272_v6 }
  0x53   : > { %765 = vrot.lane.b32.xlu0 %v572_v34, %s2865_s24  ;;  %v605_v4 = vshll.u32 %v546_v1, 16  ;;  %v337_v26 = vunpack.c.l.b16 %v273_v8  ;;  %v836_v27 = vsel %vm833_vm4, %v834_v3, %v835_v9  ;;  %v425_v28 = vor.u32 %v423_v11, %v422_v10 }
  0x54   : > { %767 = vrot.lane.b32.xlu1 %v584_v38, %s2865_s24  ;;  %v3126_v12 = vsel %vm2927_vm2, 0, %v397_v0  ;;  %v268_v29 = vpack.c.bf16 %v236_v16, %v236_v16  ;;  %v269_v32 = vpack.c.bf16 %v237_v21, %v237_v21  ;;  %v3136_v33 = vsel %vm2927_vm2, 0, %v411_v20 }
  0x55   : > { %v598_v13 = vshrl.u32 %v3126_v12, 16  ;;  %v600_v14 = vshll.u32 %v3126_v12, 16  ;;  %v607_v25 = vrot.slane %v605_v4, 1  ;;  %v548_v34 = vsel %vm2927_vm2, %v408_v63, 0 }
  0x56   : > { %889 = vrot.lane.b32.xlu2 %v842_v15, %s2866_s25  ;;  %v332_v35 = vunpack.c.l.b16 %v268_v29  ;;  %v620_v38 = vsel %vm560_vm3, %v615_v17, %v619_v18  ;;  %v361_v2 = vpack.c.b16 %v337_v26, %v336_v37  ;;  %v333_v40 = vunpack.c.l.b16 %v269_v32 }
  0x57   : > { %v602_v24 = vrot.slane %v600_v14, 1  ;;  %v3145_v41 = vsel %vm2927_vm2, 0, %v425_v28  ;;  %v843_v42 = vrot.slane %v3126_v12, 1  ;;  %v844_v45 = vrot.slane %v546_v1, 1 }
  0x58   : > { %v624_v46 = vshll.u32 %v3136_v33, 16  ;;  %v359_v47 = vpack.c.b16 %v333_v40, %v332_v35  ;;  %v846_v48 = vrot.slane %v3099_v31, 1  ;;  %v847_v15 = vrot.slane %v3108_v44, 1  ;;  %v2804_v40 = vld [vmem:[%s3929_s1 + $0x8] sm:$0x30] }
  0x59   : > { %v603_v30 = vor.u32 %v602_v24, %v598_v13  ;;  %v849_v51 = vrot.slane %v3136_v33, 1  ;;  %v850_v52 = vrot.slane %v548_v34, 1  ;;  %v3156_v54 = vsel %vm2927_vm2, %v422_v10, 0 }
  0x5a   : > { %v648_v55 = vshll.u32 %v3145_v41, 16  ;;  %v413_v58 = vshrl.u32 %v359_v47, 16  ;;  %v845_v59 = vsel %vm833_vm4, %v843_v42, %v844_v45  ;;  %v622_v61 = vshrl.u32 %v3136_v33, 16 }
  0x5b   : > { %887 = vrot.lane.b32.xlu0 %v839_v50, %s2866_s25  ;;  %v608_v39 = vsel %vm560_vm3, %v603_v30, %v607_v25  ;;  %v427_v50 = vshrl.u32 %v361_v2, 16  ;;  %v626_v62 = vrot.slane %v624_v46, 1  ;;  %v629_v63 = vshll.u32 %v548_v34, 16 }
  0x5c   : > { %771 = vrot.lane.b32.xlu1 %v608_v39, %s2865_s24  ;;  %v415_v44 = vrot.slane %v413_v58, 7  ;;  %v416_v0 = vshll.u32 %v359_v47, 16  ;;  %v848_v1 = vsel %vm833_vm4, %v846_v48, %v847_v15  ;;  %v851_v3 = vsel %vm833_vm4, %v849_v51, %v850_v52  ;;  %v2717_v51 = vld [vmem:[%s3929_s1 + $0x10] sm:$0xf]  ;;  %v2805_v52 = vld [vmem:[%s3929_s1 + $0x10] sm:$0x30] }
  0x5d   : > { %v430_v4 = vshll.u32 %v361_v2, 16  ;;  %v646_v6 = vshrl.u32 %v3145_v41, 16  ;;  %v650_v8 = vrot.slane %v648_v55, 1  ;;  %v653_v9 = vshll.u32 %v3156_v54, 16  ;;  %v2675_v2 = vld [vmem:[%s3929_s1 + $0x8] sm:$0xf] }
  0x5e   : > { %885 = vrot.lane.b32.xlu2 %v836_v27, %s2866_s25  ;;  %v429_v10 = vrot.slane %v427_v50, 7  ;;  %v627_v11 = vor.u32 %v626_v62, %v622_v61  ;;  %v631_v13 = vrot.slane %v629_v63, 1  ;;  %v418_v14 = vor.u32 %v416_v0, %v415_v44 }
  0x5f   : > { %v651_v16 = vor.u32 %v650_v8, %v646_v6  ;;  %v655_v17 = vrot.slane %v653_v9, 1  ;;  %v549_v24 = vsel %vm2927_vm2, %v415_v44, 0  ;;  %v2676_v42 = vor.u32 %v2804_v40, %v2675_v2  ;;  %v2695_v2 = vld [vmem:[%s3929_s1] sm:$0xf]  ;;  %v2803_v40 = vld [vmem:[%s3929_s1] sm:$0x30] }
  0x60   : > { %v432_v18 = vor.u32 %v430_v4, %v429_v10  ;;  %v632_v20 = vsel %vm560_vm3, %v627_v11, %v631_v13  ;;  %v3171_v21 = vsel %vm2927_vm2, 0, %v418_v14  ;;  %v551_v26 = vsel %vm2927_vm2, %v429_v10, 0 }
  0x61   : > { %v656_v25 = vsel %vm560_vm3, %v651_v16, %v655_v17  ;;  %v852_v27 = vrot.slane %v3171_v21, 1  ;;  %v853_v28 = vrot.slane %v549_v24, 1  ;;  %v859_v32 = vrot.slane %v551_v26, 1 }
  0x62   : > { %v3178_v37 = vsel %vm2927_vm2, 0, %v432_v18  ;;  %v665_v39 = vshll.u32 %v551_v26, 16  ;;  %v1034_v48 = vsel %vm1032_vm5, %v2676_v42, 0  ;;  %v2718_v55 = vor.u32 %v2805_v52, %v2717_v51 }
  0x63   : > { %773 = vrot.lane.b32.xlu0 %v620_v38, %s2865_s24  ;;  %v660_v29 = vshll.u32 %v3178_v37, 16  ;;  %v858_v30 = vrot.slane %v3178_v37, 1  ;;  %v854_v34 = vsel %vm833_vm4, %v852_v27, %v853_v28  ;;  %v658_v35 = vshrl.u32 %v3178_v37, 16  ;;  %2809 = vmatpush.bf16.msra.mxu2 %v1034_v48 }
  0x64   : > { %893 = vrot.lane.b32.xlu1 %v848_v1, %s2866_s25  ;;  %v667_v47 = vrot.slane %v665_v39, 1  ;;  %1043 = vmatpush.bf16.msra.mxu0 %v1034_v48  ;;  %v1233_v50 = vsel %vm1032_vm5, %v2718_v55, 0  ;;  %v636_v58 = vshll.u32 %v3171_v21, 16  ;;  %v641_v62 = vshll.u32 %v549_v24, 16 }
  0x65   : > { %v662_v38 = vrot.slane %v660_v29, 1  ;;  %v860_v45 = vsel %vm833_vm4, %v858_v30, %v859_v32  ;;  %v855_v8 = vrot.slane %v3145_v41, 1  ;;  %v856_v9 = vrot.slane %v3156_v54, 1 }
  0x66   : > { %891 = vrot.lane.b32.xlu2 %v845_v59, %s2866_s25  ;;  %v634_v59 = vshrl.u32 %v3171_v21, 16  ;;  %v638_v61 = vrot.slane %v636_v58, 1  ;;  %v643_v44 = vrot.slane %v641_v62, 1  ;;  %v2696_v42 = vor.u32 %v2803_v40, %v2695_v2 }
  0x67   : > { %v663_v46 = vor.u32 %v662_v38, %v658_v35  ;;  %1242 = vmatpush.bf16.msrb.mxu2 %v1233_v50  ;;  %v857_v10 = vsel %vm833_vm4, %v855_v8, %v856_v9 }
  0x68   : > { %v639_v63 = vor.u32 %v638_v61, %v634_v59 }
  0x69   : > { %v668_v15 = vsel %vm560_vm3, %v663_v46, %v667_v47  ;;  %v1133_v47 = vsel %vm1032_vm5, %v2696_v42, 0 }
  0x6a   : > { %v644_v0 = vsel %vm560_vm3, %v639_v63, %v643_v44  ;;  %2810 = vmatpush.bf16.msra.mxu3 %v1133_v47  ;;  %1142 = vmatpush.bf16.msra.mxu1 %v1133_v47 }
  0x6b   : > { %895 = vrot.lane.b32.xlu0 %v851_v3, %s2866_s25 }
  0x6c   : > { %777 = vrot.lane.b32.xlu1 %v644_v0, %s2865_s24 }
  0x6e   : > { %775 = vrot.lane.b32.xlu2 %v632_v20, %s2865_s24 }
  0x73   : > { %779 = vrot.lane.b32.xlu0 %v656_v25, %s2865_s24 }
  0x74   : > { %899 = vrot.lane.b32.xlu1 %v857_v10, %s2866_s25 }
  0x76   : > { %897 = vrot.lane.b32.xlu2 %v854_v34, %s2866_s25 }
  0x7b   : > { %901 = vrot.lane.b32.xlu0 %v860_v45, %s2866_s25 }
  0x7e   : > { %781 = vrot.lane.b32.xlu2 %v668_v15, %s2865_s24 }
  0x88   : > { %v788_v1 = vpop.permute.xlu2 %787 }
  0x89   : > { %v943_v32 = vsel %vm919_vm6, %v2977_v43, %v788_v1 }
  0x90   : > { %v908_v3 = vpop.permute.xlu2 %907 }
  0x91   : > { %v3233_v35 = vsel %vm954_vm7, %v943_v32, %v908_v3 }
  0x95   : > { %v784_v4 = vpop.permute.xlu0 %783 }
  0x96   : > { %v786_v6 = vpop.permute.xlu1 %785  ;;  %v939_v13 = vsel %vm919_vm6, %v2938_v49, %v784_v4 }
  0x97   : > { %v941_v24 = vsel %vm919_vm6, %v2945_v56, %v786_v6 }
  0x98   : > { %v792_v11 = vpop.permute.xlu2 %791 }
  0x99   : > { %v947_v58 = vsel %vm919_vm6, %v2987_v60, %v792_v11 }
  0x9d   : > { %v904_v14 = vpop.permute.xlu0 %903 }
  0x9e   : > { %v3219_v16 = vsel %vm954_vm7, %v939_v13, %v904_v14  ;;  %v906_v17 = vpop.permute.xlu1 %905 }
  0x9f   : > { %2685 = vmatmul.msk.bf16.vlgmr.msra.gmra.mxu2 %vm999_vm8, %v3219_v16  ;;  %v3226_v27 = vsel %vm954_vm7, %v941_v24, %v906_v17  ;;  %v2806_v24 = vld [vmem:[%s3931_s3] sm:$0x30] }
  0xa0   : > { %v914_v54 = vpop.permute.xlu2 %913 }
  0xa5   : > { %v790_v18 = vpop.permute.xlu0 %789 }
  0xa6   : > { %v910_v20 = vpop.permute.xlu1 %909  ;;  %v945_v46 = vsel %vm919_vm6, %v2953_v5, %v790_v18 }
  0xa7   : > { %v3254_v52 = vsel %vm954_vm7, %v945_v46, %v910_v20 }
  0xa8   : > { %v798_v25 = vpop.permute.xlu2 %797 }
  0xa9   : > { %v953_v6 = vsel %vm919_vm6, %v3031_v57, %v798_v25 }
  0xad   : > { %v912_v26 = vpop.permute.xlu0 %911 }
  0xae   : > { %v794_v49 = vpop.permute.xlu1 %793  ;;  %v3270_v62 = vsel %vm954_vm7, %v947_v58, %v912_v26 }
  0xaf   : > { %2686 = vmatmul.msk.bf16.gmra.mxu2 %vm999_vm8, %v3226_v27  ;;  %v949_v1 = vsel %vm919_vm6, %v2997_v7, %v794_v49 }
  0xb0   : > { %v890_v30 = vpop.permute.xlu2 %889  ;;  %v3289_v9 = vsel %vm954_vm7, %v949_v1, %v914_v54 }
  0xb5   : > { %v796_v28 = vpop.permute.xlu0 %795 }
  0xb6   : > { %v916_v29 = vpop.permute.xlu1 %915  ;;  %v951_v59 = vsel %vm919_vm6, %v3012_v23, %v796_v28 }
  0xb7   : > { %v3277_v60 = vsel %vm954_vm7, %v951_v59, %v916_v29 }
  0xb8   : > { %v886_v38 = vpop.permute.xlu2 %885 }
  0xbd   : > { %v918_v34 = vpop.permute.xlu0 %917 }
  0xbe   : > { %v770_v56 = vpop.permute.xlu1 %769  ;;  %v3297_v7 = vsel %vm954_vm7, %v953_v6, %v918_v34 }
  0xbf   : > { %2687 = vmatmul.msk.bf16.gmra.mxu2 %vm999_vm8, %v3233_v35 }
  0xc0   : > { %v892_v15 = vpop.permute.xlu2 %891 }
  0xc5   : > { %v766_v39 = vpop.permute.xlu0 %765 }
  0xc6   : > { %v921_v43 = vsel %vm919_vm6, %v3048_v19, %v766_v39  ;;  %v768_v45 = vpop.permute.xlu1 %767 }
  0xc7   : > { %v3249_v48 = vsel %vm954_vm7, %v921_v43, %v886_v38  ;;  %v923_v51 = vsel %vm919_vm6, %v3081_v53, %v768_v45  ;;  %v925_v53 = vsel %vm919_vm6, %v3055_v22, %v770_v56 }
  0xc8   : > { %2697 = vmatmul.msk.bf16.vlgmr.msra.gmra.mxu1 %vm999_vm8, %v3249_v48  ;;  %v776_v55 = vpop.permute.xlu2 %775  ;;  %v960_v61 = vsel %vm954_vm7, %v925_v53, %v890_v30 }
  0xc9   : > { %v931_v13 = vsel %vm919_vm6, %v3136_v33, %v776_v55 }
  0xcd   : > { %v888_v19 = vpop.permute.xlu0 %887 }
  0xce   : > { %v958_v5 = vsel %vm954_vm7, %v923_v51, %v888_v19  ;;  %v772_v0 = vpop.permute.xlu1 %771 }
  0xcf   : > { %2677 = vmatmul.msk.bf16.vlgmr.msra.gmra.mxu0 %vm999_vm8, %v958_v5  ;;  %2688 = vmatmul.msk.bf16.gmra.mxu2 %vm999_vm8, %v3254_v52  ;;  %v927_v3 = vsel %vm919_vm6, %v3126_v12, %v772_v0 }
  0xd0   : > { %v898_v44 = vpop.permute.xlu2 %897  ;;  %v962_v8 = vsel %vm954_vm7, %v927_v3, %v892_v15 }
  0xd5   : > { %v774_v50 = vpop.permute.xlu0 %773 }
  0xd6   : > { %v929_v57 = vsel %vm919_vm6, %v3099_v31, %v774_v50  ;;  %v894_v12 = vpop.permute.xlu1 %893 }
  0xd8   : > { %2698 = vmatmul.msk.bf16.gmra.mxu1 %vm999_vm8, %v958_v5  ;;  %v782_v23 = vpop.permute.xlu2 %781 }
  0xd9   : > { %v937_v4 = vsel %vm919_vm6, %v3178_v37, %v782_v23  ;;  %v964_v37 = vsel %vm954_vm7, %v929_v57, %v894_v12 }
  0xdd   : > { %v896_v63 = vpop.permute.xlu0 %895 }
  0xde   : > { %v966_v14 = vsel %vm954_vm7, %v931_v13, %v896_v63  ;;  %v778_v31 = vpop.permute.xlu1 %777  ;;  %v3395_v63 = vld [vmem:[%s3930_s2] ss:$0 sm:$0xff] }
  0xdf   : > { %2678 = vmatmul.msk.bf16.gmra.mxu0 %vm999_vm8, %v960_v61  ;;  %2689 = vmatmul.msk.bf16.gmra.mxu2 %vm999_vm8, %v3270_v62  ;;  %v933_v17 = vsel %vm919_vm6, %v3171_v21, %v778_v31  ;;  %v2759_v21 = vld [vmem:[%s3931_s3] sm:$0xf] }
  0xe0   : > { %v968_v54 = vsel %vm954_vm7, %v933_v17, %v898_v44  ;;  %v2760_v26 = vor.u32 %v2806_v24, %v2759_v21 }
  0xe2   : > { %v2252_v28 = vsel %vm1032_vm5, %v2760_v26, 0  ;;  %v2781_v26 = vld [vmem:[%s3931_s3 + $0x10] sm:$0xf] }
  0xe3   : > { %2261 = vmatpush.bf16.msrb.mxu0 %v2252_v28 }
  0xe5   : > { %v780_v22 = vpop.permute.xlu0 %779 }
  0xe6   : > { %v935_v18 = vsel %vm919_vm6, %v3145_v41, %v780_v22  ;;  %v900_v20 = vpop.permute.xlu1 %899 }
  0xe7   : > { %v970_v49 = vsel %vm954_vm7, %v935_v18, %v900_v20 }
  0xe8   : > { %2699 = vmatmul.msk.bf16.gmra.mxu1 %vm999_vm8, %v960_v61 }
  0xed   : > { %v902_v10 = vpop.permute.xlu0 %901 }
  0xee   : > { %v972_v11 = vsel %vm954_vm7, %v937_v4, %v902_v10  ;;  %v2807_v4 = vld [vmem:[%s3931_s3 + $0x8] sm:$0x30] }
  0xef   : > { %2679 = vmatmul.msk.bf16.gmra.mxu0 %vm999_vm8, %v962_v8  ;;  %2690 = vmatmul.msk.bf16.gmra.mxu2 %vm999_vm8, %v3289_v9 }
  0xf0   : > { %2705 = vmatmul.msk.bf16.vlgmr.msra.gmra.mxu3 %vm999_vm8, %v972_v11 }
  0xf8   : > { %2700 = vmatmul.msk.bf16.gmra.mxu1 %vm999_vm8, %v962_v8 }
  0xff   : > { %2680 = vmatmul.msk.bf16.gmra.mxu0 %vm999_vm8, %v964_v37  ;;  %2691 = vmatmul.msk.bf16.gmra.mxu2 %vm999_vm8, %v3277_v60 }
 0x100   : > { %2706 = vmatmul.msk.bf16.gmra.mxu3 %vm999_vm8, %v3219_v16 }
 0x108   : > { %2701 = vmatmul.msk.bf16.gmra.mxu1 %vm999_vm8, %v964_v37 }
 0x10f   : > { %2681 = vmatmul.msk.bf16.gmra.mxu0 %vm999_vm8, %v966_v14  ;;  %2692 = vmatmul.msk.bf16.gmra.mxu2 %vm999_vm8, %v3297_v7 }
 0x110   : > { %2707 = vmatmul.msk.bf16.gmra.mxu3 %vm999_vm8, %v3226_v27 }
 0x118   : > { %2702 = vmatmul.msk.bf16.gmra.mxu1 %vm999_vm8, %v966_v14 }
 0x11f   : > { %2682 = vmatmul.msk.bf16.gmra.mxu0 %vm999_vm8, %v968_v54  ;;  %2719 = vmatmul.msk.bf16.vlgmr.msrb.gmra.mxu2 %vm999_vm8, %v960_v61 }
 0x120   : > { %2708 = vmatmul.msk.bf16.gmra.mxu3 %vm999_vm8, %v3233_v35 }
 0x122   : > { %v3326_v33 = vpop.f32.mrf.mxu2 }
 0x128   : > { %2703 = vmatmul.msk.bf16.gmra.mxu1 %vm999_vm8, %v968_v54 }
 0x12a   : > { %v3336_v25 = vpop.f32.mrf.mxu2 }
 0x12f   : > { %2683 = vmatmul.msk.bf16.gmra.mxu0 %vm999_vm8, %v970_v49  ;;  %2720 = vmatmul.msk.bf16.gmra.mxu2 %vm999_vm8, %v962_v8 }
 0x130   : > { %2709 = vmatmul.msk.bf16.gmra.mxu3 %vm999_vm8, %v3254_v52 }
 0x132   : > { %v3345_v41 = vpop.f32.mrf.mxu2 }
 0x138   : > { %2704 = vmatmul.msk.bf16.gmra.mxu1 %vm999_vm8, %v970_v49 }
 0x13a   : > { %v3347_v29 = vpop.f32.mrf.mxu2 }
 0x13f   : > { %2684 = vmatmul.msk.bf16.gmra.mxu0 %vm999_vm8, %v972_v11  ;;  %2721 = vmatmul.msk.bf16.gmra.mxu2 %vm999_vm8, %v964_v37 }
 0x140   : > { %2710 = vmatmul.msk.bf16.gmra.mxu3 %vm999_vm8, %v3270_v62 }
 0x142   : > { %v3354_v30 = vpop.f32.mrf.mxu2 }
 0x145   : > { %v1144_v42 = vpop.f32.mrf.mxu1 }
 0x14a   : > { %v3356_v32 = vpop.f32.mrf.mxu2 }
 0x14c   : > { %v1045_v43 = vpop.f32.mrf.mxu0 }
 0x14d   : > { %v1146_v15 = vpop.f32.mrf.mxu1  ;;  %v1145_v53 = vadd.f32 %v1144_v42, %v1045_v43 }
 0x14f   : > { %2722 = vmatmul.msk.bf16.gmra.mxu2 %vm999_vm8, %v966_v14  ;;  %2761 = vmatmul.msk.bf16.vlgmr.msrb.gmra.mxu0 %vm999_vm8, %v3249_v48 }
 0x150   : > { %2711 = vmatmul.msk.bf16.gmra.mxu3 %vm999_vm8, %v3289_v9 }
 0x152   : > { %v3363_v34 = vpop.f32.mrf.mxu2 }
 0x154   : > { %v1047_v47 = vpop.f32.mrf.mxu0 }
 0x155   : > { %v1149_v5 = vpop.f32.mrf.mxu1  ;;  %v1147_v22 = vadd.f32 %v1146_v15, %v1047_v47 }
 0x15a   : > { %v3365_v56 = vpop.f32.mrf.mxu2 }
 0x15c   : > { %v1050_v19 = vpop.f32.mrf.mxu0 }
 0x15d   : > { %v1151_v58 = vpop.f32.mrf.mxu1  ;;  %v1150_v12 = vadd.f32 %v1149_v5, %v1050_v19 }
 0x15f   : > { %2723 = vmatmul.msk.bf16.gmra.mxu2 %vm999_vm8, %v968_v54 }
 0x160   : > { %2712 = vmatmul.msk.bf16.gmra.mxu3 %vm999_vm8, %v3277_v60 }
 0x162   : > { %v3370_v38 = vpop.f32.mrf.mxu2 }
 0x164   : > { %v1052_v50 = vpop.f32.mrf.mxu0 }
 0x165   : > { %v1154_v0 = vpop.f32.mrf.mxu1 }
 0x16a   : > { %v3372_v39 = vpop.f32.mrf.mxu2 }
 0x16c   : > { %v1055_v44 = vpop.f32.mrf.mxu0 }
 0x16d   : > { %v1156_v18 = vpop.f32.mrf.mxu1 }
 0x16f   : > { %2724 = vmatmul.msk.bf16.gmra.mxu2 %vm999_vm8, %v970_v49  ;;  %v1152_v49 = vadd.f32 %v1151_v58, %v1052_v50 }
 0x172   : > { %v3375_v2 = vpop.f32.mrf.mxu2 }
 0x174   : > { %v1057_v54 = vpop.f32.mrf.mxu0 }
 0x17a   : > { %v3377_v40 = vpop.f32.mrf.mxu2 }
 0x17c   : > { %v1060_v50 = vpop.f32.mrf.mxu0 }
 0x17f   : > { %2725 = vmatmul.msk.bf16.gmra.mxu2 %vm999_vm8, %v972_v11 }
 0x182   : > { %v3380_v45 = vpop.f32.mrf.mxu2 }
 0x18a   : > { %v3382_v46 = vpop.f32.mrf.mxu2 }
 0x18f   : > { %2726 = vmatmul.msk.bf16.gmra.mxu2 %vm999_vm8, %v3219_v16 }
 0x192   : > { %v3386_v51 = vpop.f32.mrf.mxu2 }
 0x19a   : > { %v3388_v55 = vpop.f32.mrf.mxu2 }
 0x19f   : > { %2727 = vmatmul.msk.bf16.gmra.mxu2 %vm999_vm8, %v3226_v27  ;;  %v2739_v27 = vld [vmem:[%s3931_s3 + $0x8] sm:$0xf] }
 0x1a0   : > { %v2740_v6 = vor.u32 %v2807_v4, %v2739_v27 }
 0x1a2   : > { %v1244_v59 = vpop.f32.mrf.mxu2  ;;  %v2155_v10 = vsel %vm1032_vm5, %v2740_v6, 0 }
 0x1a3   : > { %v1324_v61 = vadd.f32 %v1244_v59, %v1145_v53  ;;  %2164 = vmatpush.bf16.msrb.mxu3 %v2155_v10  ;;  %v1159_v59 = vpop.f32.mrf.mxu1 }
 0x1a5   : > { %v1360_v16 = vadd.f32 %v3395_v63, %v1324_v61 }
 0x1a7   : > { %v1392_v1 = vmax.f32 %v1360_v16, 0.0 }
 0x1a9   : > { %v1424_v11 = vpack.c.bf16 %v1392_v1, %v1392_v1 }
 0x1aa   : > { %v1246_v23 = vpop.f32.mrf.mxu2 }
 0x1ab   : > { %v1325_v3 = vadd.f32 %v1246_v23, %v1147_v22  ;;  %v1488_v14 = vunpack.c.l.b16 %v1424_v11  ;;  %v1155_v11 = vadd.f32 %v1154_v0, %v1055_v44  ;;  %v1157_v44 = vadd.f32 %v1156_v18, %v1057_v54 }
 0x1ad   : > { %v1361_v8 = vadd.f32 %v3395_v63, %v1325_v3 }
 0x1af   : > { %v1393_v57 = vmax.f32 %v1361_v8, 0.0  ;;  %2728 = vmatmul.msk.bf16.gmra.mxu2 %vm999_vm8, %v3233_v35  ;;  %v2808_v35 = vld [vmem:[%s3931_s3 + $0x10] sm:$0x30] }
 0x1b0   : > { %v2782_v42 = vor.u32 %v2808_v35, %v2781_v26  ;;  %v1062_v35 = vpop.f32.mrf.mxu0 }
 0x1b1   : > { %v1425_v37 = vpack.c.bf16 %v1393_v57, %v1393_v57 }
 0x1b2   : > { %v1249_v13 = vpop.f32.mrf.mxu2  ;;  %v2352_v61 = vsel %vm1032_vm5, %v2782_v42, 0 }
 0x1b3   : > { %v1489_v31 = vunpack.c.l.b16 %v1425_v37  ;;  %v1326_v17 = vadd.f32 %v1249_v13, %v1150_v12  ;;  %2361 = vmatpush.bf16.msrb.mxu1 %v2352_v61 }
 0x1b5   : > { %v1520_v20 = vpack.c.b16 %v1489_v31, %v1488_v14  ;;  %v1362_v24 = vadd.f32 %v3395_v63, %v1326_v17 }
 0x1b7   : > { %v1537_v21 = vshrl.u32 %v1520_v20, 16  ;;  %v1540_v28 = vshll.u32 %v1520_v20, 16  ;;  %v1394_v15 = vmax.f32 %v1362_v24, 0.0 }
 0x1b9   : > { %v1539_v43 = vrot.slane %v1537_v21, 7  ;;  %v1426_v27 = vpack.c.bf16 %v1394_v15, %v1394_v15 }
 0x1ba   : > { %v1251_v47 = vpop.f32.mrf.mxu2 }
 0x1bb   : > { %v1327_v19 = vadd.f32 %v1251_v47, %v1152_v49  ;;  %v1542_v5 = vor.u32 %v1540_v28, %v1539_v43  ;;  %v1696_v53 = vsel %vm2927_vm2, %v1539_v43, 0  ;;  %v1490_v14 = vunpack.c.l.b16 %v1426_v27 }
 0x1bc   : > { %v1969_v23 = vrot.slane %v1696_v53, 1  ;;  %v1720_v3 = vshll.u32 %v1696_v53, 16 }
 0x1bd   : > { %v1363_v16 = vadd.f32 %v3395_v63, %v1327_v19  ;;  %v3421_v22 = vsel %vm2927_vm2, 0, %v1542_v5 }
 0x1be   : > { %v1968_v58 = vrot.slane %v3421_v22, 1  ;;  %v1715_v1 = vshll.u32 %v3421_v22, 16  ;;  %v1713_v8 = vshrl.u32 %v3421_v22, 16  ;;  %v1722_v13 = vrot.slane %v1720_v3, 1 }
 0x1bf   : > { %v1395_v4 = vmax.f32 %v1363_v16, 0.0  ;;  %2729 = vmatmul.msk.bf16.gmra.mxu2 %vm999_vm8, %v3254_v52  ;;  %v1161_v52 = vpop.f32.mrf.mxu1 }
 0x1c0   : > { %v1970_v6 = vsel %vm833_vm4, %v1968_v58, %v1969_v23  ;;  %v1717_v10 = vrot.slane %v1715_v1, 1 }
 0x1c1   : > { %v1427_v57 = vpack.c.bf16 %v1395_v4, %v1395_v4  ;;  %2016 = vrot.lane.b32.xlu2 %v1970_v6, %s2866_s25  ;;  %v1160_v4 = vadd.f32 %v1159_v59, %v1060_v50 }
 0x1c2   : > { %v1254_v12 = vpop.f32.mrf.mxu2  ;;  %v1718_v37 = vor.u32 %v1717_v10, %v1713_v8  ;;  %v1065_v8 = vpop.f32.mrf.mxu0 }
 0x1c3   : > { %v1491_v31 = vunpack.c.l.b16 %v1427_v57  ;;  %v1328_v17 = vadd.f32 %v1254_v12, %v1155_v11 }
 0x1c4   : > { %v1723_v20 = vsel %vm560_vm3, %v1718_v37, %v1722_v13 }
 0x1c5   : > { %v1521_v21 = vpack.c.b16 %v1491_v31, %v1490_v14  ;;  %1904 = vrot.lane.b32.xlu1 %v1723_v20, %s2865_s24  ;;  %v1364_v26 = vadd.f32 %v3395_v63, %v1328_v17  ;;  %v1162_v20 = vadd.f32 %v1161_v52, %v1062_v35 }
 0x1c7   : > { %v1544_v24 = vshrl.u32 %v1521_v21, 16  ;;  %v1547_v0 = vshll.u32 %v1521_v21, 16  ;;  %v1396_v43 = vmax.f32 %v1364_v26, 0.0  ;;  %v1164_v23 = vpop.f32.mrf.mxu1 }
 0x1c9   : > { %v1546_v49 = vrot.slane %v1544_v24, 7  ;;  %v1428_v16 = vpack.c.bf16 %v1396_v43, %v1396_v43 }
 0x1ca   : > { %v1256_v28 = vpop.f32.mrf.mxu2 }
 0x1cb   : > { %v1329_v42 = vadd.f32 %v1256_v28, %v1157_v44  ;;  %v1549_v47 = vor.u32 %v1547_v0, %v1546_v49  ;;  %v1697_v15 = vsel %vm2927_vm2, %v1546_v49, 0  ;;  %v1492_v12 = vunpack.c.l.b16 %v1428_v16  ;;  %v1067_v28 = vpop.f32.mrf.mxu0 }
 0x1cc   : > { %v1972_v61 = vrot.slane %v1697_v15, 1  ;;  %v1732_v18 = vshll.u32 %v1697_v15, 16  ;;  %v1165_v16 = vadd.f32 %v1164_v23, %v1065_v8 }
 0x1cd   : > { %v1365_v19 = vadd.f32 %v3395_v63, %v1329_v42  ;;  %v3438_v5 = vsel %vm2927_vm2, 0, %v1549_v47 }
 0x1ce   : > { %v1971_v53 = vrot.slane %v3438_v5, 1  ;;  %v1727_v54 = vshll.u32 %v3438_v5, 16  ;;  %v1725_v3 = vshrl.u32 %v3438_v5, 16  ;;  %v1734_v57 = vrot.slane %v1732_v18, 1 }
 0x1cf   : > { %v1397_v58 = vmax.f32 %v1365_v19, 0.0  ;;  %2730 = vmatmul.msk.bf16.gmra.mxu2 %vm999_vm8, %v3270_v62  ;;  %v1166_v21 = vpop.f32.mrf.mxu1 }
 0x1d0   : > { %v1973_v1 = vsel %vm833_vm4, %v1971_v53, %v1972_v61  ;;  %v1729_v27 = vrot.slane %v1727_v54, 1  ;;  %v1167_v23 = vadd.f32 %v1166_v21, %v1067_v28 }
 0x1d1   : > { %v1429_v6 = vpack.c.bf16 %v1397_v58, %v1397_v58  ;;  %2018 = vrot.lane.b32.xlu1 %v1973_v1, %s2866_s25 }
 0x1d2   : > { %v1259_v10 = vpop.f32.mrf.mxu2  ;;  %v1730_v11 = vor.u32 %v1729_v27, %v1725_v3 }
 0x1d3   : > { %v1493_v37 = vunpack.c.l.b16 %v1429_v6  ;;  %v1330_v13 = vadd.f32 %v1259_v10, %v1160_v4 }
 0x1d4   : > { %v1735_v14 = vsel %vm560_vm3, %v1730_v11, %v1734_v57 }
 0x1d5   : > { %v1522_v62 = vpack.c.b16 %v1493_v37, %v1492_v12  ;;  %1906 = vrot.lane.b32.xlu0 %v1735_v14, %s2865_s24  ;;  %v1366_v17 = vadd.f32 %v3395_v63, %v1330_v13 }
 0x1d7   : > { %v1551_v31 = vshrl.u32 %v1522_v62, 16  ;;  %v1554_v59 = vshll.u32 %v1522_v62, 16  ;;  %v1398_v26 = vmax.f32 %v1366_v17, 0.0  ;;  %v1169_v11 = vpop.f32.mrf.mxu1 }
 0x1d9   : > { %v1553_v50 = vrot.slane %v1551_v31, 7  ;;  %v1430_v19 = vpack.c.bf16 %v1398_v26, %v1398_v26 }
 0x1da   : > { %v1261_v24 = vpop.f32.mrf.mxu2 }
 0x1db   : > { %v1331_v44 = vadd.f32 %v1261_v24, %v1162_v20  ;;  %v1556_v0 = vor.u32 %v1554_v59, %v1553_v50  ;;  %v1698_v49 = vsel %vm2927_vm2, %v1553_v50, 0  ;;  %v1494_v4 = vunpack.c.l.b16 %v1430_v19 }
 0x1dc   : > { %v1975_v52 = vrot.slane %v1698_v49, 1  ;;  %v1744_v15 = vshll.u32 %v1698_v49, 16 }
 0x1dd   : > { %v1367_v43 = vadd.f32 %v3395_v63, %v1331_v44  ;;  %v3455_v42 = vsel %vm2927_vm2, 0, %v1556_v0 }
 0x1de   : > { %v1974_v47 = vrot.slane %v3455_v42, 1  ;;  %v1739_v35 = vshll.u32 %v3455_v42, 16  ;;  %v1737_v54 = vshrl.u32 %v3455_v42, 16  ;;  %v1746_v27 = vrot.slane %v1744_v15, 1 }
 0x1df   : > { %v1399_v53 = vmax.f32 %v1367_v43, 0.0  ;;  %2731 = vmatmul.msk.bf16.gmra.mxu2 %vm999_vm8, %v3289_v9  ;;  %v1070_v9 = vpop.f32.mrf.mxu0  ;;  %v1171_v26 = vpop.f32.mrf.mxu1 }
 0x1e0   : > { %v1976_v61 = vsel %vm833_vm4, %v1974_v47, %v1975_v52  ;;  %v1741_v18 = vrot.slane %v1739_v35, 1  ;;  %v1170_v19 = vadd.f32 %v1169_v11, %v1070_v9 }
 0x1e1   : > { %v1431_v58 = vpack.c.bf16 %v1399_v53, %v1399_v53  ;;  %2020 = vrot.lane.b32.xlu0 %v1976_v61, %s2866_s25 }
 0x1e2   : > { %v1264_v1 = vpop.f32.mrf.mxu2  ;;  %v1742_v3 = vor.u32 %v1741_v18, %v1737_v54 }
 0x1e3   : > { %v1495_v6 = vunpack.c.l.b16 %v1431_v58  ;;  %v1332_v10 = vadd.f32 %v1264_v1, %v1165_v16 }
 0x1e4   : > { %v1747_v57 = vsel %vm560_vm3, %v1742_v3, %v1746_v27 }
 0x1e5   : > { %v1523_v12 = vpack.c.b16 %v1495_v6, %v1494_v4  ;;  %1908 = vrot.lane.b32.xlu2 %v1747_v57, %s2865_s24  ;;  %v1368_v13 = vadd.f32 %v3395_v63, %v1332_v10 }
 0x1e7   : > { %v1558_v37 = vshrl.u32 %v1523_v12, 16  ;;  %v1561_v8 = vshll.u32 %v1523_v12, 16  ;;  %v1400_v31 = vmax.f32 %v1368_v13, 0.0  ;;  %v1072_v47 = vpop.f32.mrf.mxu0  ;;  %v1174_v6 = vpop.f32.mrf.mxu1 }
 0x1e8   : > { %v1172_v10 = vadd.f32 %v1171_v26, %v1072_v47 }
 0x1e9   : > { %v1560_v14 = vrot.slane %v1558_v37, 7  ;;  %v1432_v28 = vpack.c.bf16 %v1400_v31, %v1400_v31 }
 0x1ea   : > { %v1266_v62 = vpop.f32.mrf.mxu2 }
 0x1eb   : > { %v1333_v17 = vadd.f32 %v1266_v62, %v1167_v23  ;;  %v1563_v20 = vor.u32 %v1561_v8, %v1560_v14  ;;  %v1699_v59 = vsel %vm2927_vm2, %v1560_v14, 0  ;;  %v1496_v16 = vunpack.c.l.b16 %v1432_v28 }
 0x1ec   : > { %v1978_v0 = vrot.slane %v1699_v59, 1  ;;  %v1756_v49 = vshll.u32 %v1699_v59, 16 }
 0x1ed   : > { %v1369_v50 = vadd.f32 %v3395_v63, %v1333_v17  ;;  %v3472_v24 = vsel %vm2927_vm2, 0, %v1563_v20 }
 0x1ee   : > { %v1977_v44 = vrot.slane %v3472_v24, 1  ;;  %v1751_v21 = vshll.u32 %v3472_v24, 16  ;;  %v1749_v35 = vshrl.u32 %v3472_v24, 16  ;;  %v1758_v18 = vrot.slane %v1756_v49, 1 }
 0x1ef   : > { %v1401_v43 = vmax.f32 %v1369_v50, 0.0  ;;  %2732 = vmatmul.msk.bf16.gmra.mxu2 %vm999_vm8, %v3277_v60  ;;  %v1075_v12 = vpop.f32.mrf.mxu0  ;;  %v1176_v47 = vpop.f32.mrf.mxu1 }
 0x1f0   : > { %v1979_v52 = vsel %vm833_vm4, %v1977_v44, %v1978_v0  ;;  %v1753_v15 = vrot.slane %v1751_v21, 1  ;;  %v3495_v44 = vpop.f32.mrf.mxu3  ;;  %v1175_v28 = vadd.f32 %v1174_v6, %v1075_v12 }
 0x1f1   : > { %v1433_v53 = vpack.c.bf16 %v1401_v43, %v1401_v43  ;;  %2022 = vrot.lane.b32.xlu2 %v1979_v52, %s2866_s25 }
 0x1f2   : > { %v1269_v61 = vpop.f32.mrf.mxu2  ;;  %v1754_v54 = vor.u32 %v1753_v15, %v1749_v35 }
 0x1f3   : > { %v1497_v58 = vunpack.c.l.b16 %v1433_v53  ;;  %v1334_v1 = vadd.f32 %v1269_v61, %v1170_v19 }
 0x1f4   : > { %v1759_v3 = vsel %vm560_vm3, %v1754_v54, %v1758_v18 }
 0x1f5   : > { %v1524_v27 = vpack.c.b16 %v1497_v58, %v1496_v16  ;;  %1910 = vrot.lane.b32.xlu1 %v1759_v3, %s2865_s24  ;;  %v1370_v4 = vadd.f32 %v3395_v63, %v1334_v1 }
 0x1f7   : > { %v1565_v60 = vshrl.u32 %v1524_v27, 16  ;;  %v1568_v57 = vshll.u32 %v1524_v27, 16  ;;  %v1402_v13 = vmax.f32 %v1370_v4, 0.0  ;;  %v1077_v54 = vpop.f32.mrf.mxu0  ;;  %v1179_v12 = vpop.f32.mrf.mxu1 }
 0x1f8   : > { %v1177_v1 = vadd.f32 %v1176_v47, %v1077_v54 }
 0x1f9   : > { %v1567_v11 = vrot.slane %v1565_v60, 7  ;;  %v1434_v50 = vpack.c.bf16 %v1402_v13, %v1402_v13  ;;  %v3503_v60 = vpop.f32.mrf.mxu3 }
 0x1fa   : > { %v1271_v9 = vpop.f32.mrf.mxu2 }
 0x1fb   : > { %v1570_v37 = vor.u32 %v1568_v57, %v1567_v11  ;;  %v1335_v23 = vadd.f32 %v1271_v9, %v1172_v10  ;;  %v1700_v8 = vsel %vm2927_vm2, %v1567_v11, 0  ;;  %v1498_v19 = vunpack.c.l.b16 %v1434_v50 }
 0x1fc   : > { %v1981_v17 = vrot.slane %v1700_v8, 1  ;;  %v1768_v59 = vshll.u32 %v1700_v8, 16 }
 0x1fd   : > { %v1371_v14 = vadd.f32 %v3395_v63, %v1335_v23  ;;  %v3489_v62 = vsel %vm2927_vm2, 0, %v1570_v37 }
 0x1fe   : > { %v1980_v31 = vrot.slane %v3489_v62, 1  ;;  %v1763_v20 = vshll.u32 %v3489_v62, 16  ;;  %v1761_v21 = vshrl.u32 %v3489_v62, 16  ;;  %v1770_v15 = vrot.slane %v1768_v59, 1 }
 0x1ff   : > { %v1403_v26 = vmax.f32 %v1371_v14, 0.0  ;;  %2733 = vmatmul.msk.bf16.gmra.mxu2 %vm999_vm8, %v3297_v7  ;;  %v1080_v13 = vpop.f32.mrf.mxu0 }
 0x200   : > { %v1982_v0 = vsel %vm833_vm4, %v1980_v31, %v1981_v17  ;;  %v1765_v49 = vrot.slane %v1763_v20, 1 }
 0x201   : > { %v1435_v43 = vpack.c.bf16 %v1403_v26, %v1403_v26  ;;  %2024 = vrot.lane.b32.xlu1 %v1982_v0, %s2866_s25  ;;  %v1180_v0 = vadd.f32 %v1179_v12, %v1080_v13 }
 0x202   : > { %v1274_v52 = vpop.f32.mrf.mxu2  ;;  %v1766_v35 = vor.u32 %v1765_v49, %v1761_v21 }
 0x203   : > { %v1499_v53 = vunpack.c.l.b16 %v1435_v43  ;;  %v1336_v61 = vadd.f32 %v1274_v52, %v1175_v28 }
 0x204   : > { %v1771_v7 = vsel %vm560_vm3, %v1766_v35, %v1770_v15  ;;  %v1189_v15 = vpop.f32.mrf.mxu3 }
 0x205   : > { %v1525_v18 = vpack.c.b16 %v1499_v53, %v1498_v19  ;;  %1912 = vrot.lane.b32.xlu0 %v1771_v7, %s2865_s24  ;;  %v1372_v58 = vadd.f32 %v3395_v63, %v1336_v61  ;;  %v1181_v61 = vpop.f32.mrf.mxu1 }
 0x207   : > { %v1572_v16 = vshrl.u32 %v1525_v18, 16  ;;  %v1575_v27 = vshll.u32 %v1525_v18, 16  ;;  %v1404_v10 = vmax.f32 %v1372_v58, 0.0  ;;  %v1082_v18 = vpop.f32.mrf.mxu0 }
 0x209   : > { %v1574_v3 = vrot.slane %v1572_v16, 7  ;;  %v1436_v17 = vpack.c.bf16 %v1404_v10, %v1404_v10  ;;  %v1182_v16 = vadd.f32 %v1181_v61, %v1082_v18 }
 0x20a   : > { %v1276_v4 = vpop.f32.mrf.mxu2 }
 0x20b   : > { %v1577_v6 = vor.u32 %v1575_v27, %v1574_v3  ;;  %v1337_v11 = vadd.f32 %v1276_v4, %v1177_v1  ;;  %v1701_v57 = vsel %vm2927_vm2, %v1574_v3, 0  ;;  %v1500_v47 = vunpack.c.l.b16 %v1436_v17 }
 0x20c   : > { %v1984_v8 = vrot.slane %v1701_v57, 1  ;;  %v1780_v31 = vshll.u32 %v1701_v57, 16  ;;  %v3529_v12 = vpop.f32.mrf.mxu3 }
 0x20d   : > { %v1373_v9 = vadd.f32 %v3395_v63, %v1337_v11  ;;  %v3510_v37 = vsel %vm2927_vm2, 0, %v1577_v6 }
 0x20e   : > { %v1983_v23 = vrot.slane %v3510_v37, 1  ;;  %v1775_v14 = vshll.u32 %v3510_v37, 16  ;;  %v1773_v50 = vshrl.u32 %v3510_v37, 16  ;;  %v1782_v43 = vrot.slane %v1780_v31, 1 }
 0x20f   : > { %v1405_v20 = vmax.f32 %v1373_v9, 0.0  ;;  %2734 = vmatmul.msk.bf16.gmra.mxu2 %vm999_vm8, %v3249_v48 }
 0x210   : > { %v1985_v59 = vsel %vm833_vm4, %v1983_v23, %v1984_v8  ;;  %v1777_v26 = vrot.slane %v1775_v14, 1 }
 0x211   : > { %v1437_v21 = vpack.c.bf16 %v1405_v20, %v1405_v20  ;;  %2026 = vrot.lane.b32.xlu0 %v1985_v59, %s2866_s25 }
 0x212   : > { %v1279_v49 = vpop.f32.mrf.mxu2  ;;  %v1778_v28 = vor.u32 %v1777_v26, %v1773_v50  ;;  %v1185_v50 = vadd.f32 %v3495_v44, %v3326_v33  ;;  %v1187_v33 = vadd.f32 %v3503_v60, %v3336_v25 }
 0x213   : > { %v1501_v52 = vunpack.c.l.b16 %v1437_v21  ;;  %v1338_v35 = vadd.f32 %v1279_v49, %v1180_v0 }
 0x214   : > { %v1783_v19 = vsel %vm560_vm3, %v1778_v28, %v1782_v43  ;;  %v1194_v61 = vpop.f32.mrf.mxu3 }
 0x215   : > { %v1526_v53 = vpack.c.b16 %v1501_v52, %v1500_v47  ;;  %1914 = vrot.lane.b32.xlu2 %v1783_v19, %s2865_s24  ;;  %v1374_v7 = vadd.f32 %v3395_v63, %v1338_v35 }
 0x217   : > { %v1579_v54 = vshrl.u32 %v1526_v53, 16  ;;  %v1582_v1 = vshll.u32 %v1526_v53, 16  ;;  %v1406_v4 = vmax.f32 %v1374_v7, 0.0 }
 0x219   : > { %v1581_v58 = vrot.slane %v1579_v54, 7  ;;  %v1438_v14 = vpack.c.bf16 %v1406_v4, %v1406_v4 }
 0x21a   : > { %v1281_v3 = vpop.f32.mrf.mxu2 }
 0x21b   : > { %v1584_v27 = vor.u32 %v1582_v1, %v1581_v58  ;;  %v1339_v6 = vadd.f32 %v1281_v3, %v1182_v16  ;;  %v1702_v10 = vsel %vm2927_vm2, %v1581_v58, 0  ;;  %v1502_v28 = vunpack.c.l.b16 %v1438_v14 }
 0x21c   : > { %v1987_v13 = vrot.slane %v1702_v10, 1  ;;  %v1792_v8 = vshll.u32 %v1702_v10, 16 }
 0x21d   : > { %v1375_v11 = vadd.f32 %v3395_v63, %v1339_v6  ;;  %v3527_v57 = vsel %vm2927_vm2, 0, %v1584_v27 }
 0x21e   : > { %v1986_v9 = vrot.slane %v3527_v57, 1  ;;  %v1787_v23 = vshll.u32 %v3527_v57, 16  ;;  %v1785_v20 = vshrl.u32 %v3527_v57, 16  ;;  %v1794_v49 = vrot.slane %v1792_v8, 1 }
 0x21f   : > { %v1407_v31 = vmax.f32 %v1375_v11, 0.0  ;;  %v1190_v8 = vadd.f32 %v1189_v15, %v3345_v41  ;;  %v2017_v41 = vpop.permute.xlu2 %2016 }
 0x220   : > { %v1988_v17 = vsel %vm833_vm4, %v1986_v9, %v1987_v13  ;;  %v1789_v59 = vrot.slane %v1787_v23, 1 }
 0x221   : > { %v1439_v26 = vpack.c.bf16 %v1407_v31, %v1407_v31  ;;  %2028 = vrot.lane.b32.xlu2 %v1988_v17, %s2866_s25  ;;  %v1196_v31 = vpop.f32.mrf.mxu3 }
 0x222   : > { %v1284_v0 = vpop.f32.mrf.mxu2  ;;  %v1790_v21 = vor.u32 %v1789_v59, %v1785_v20 }
 0x223   : > { %v1503_v43 = vunpack.c.l.b16 %v1439_v26  ;;  %v1340_v47 = vadd.f32 %v1284_v0, %v1185_v50 }
 0x224   : > { %v1795_v52 = vsel %vm560_vm3, %v1790_v21, %v1794_v49 }
 0x225   : > { %v1527_v35 = vpack.c.b16 %v1503_v43, %v1502_v28  ;;  %1916 = vrot.lane.b32.xlu1 %v1795_v52, %s2865_s24  ;;  %v1376_v53 = vadd.f32 %v3395_v63, %v1340_v47  ;;  %v1192_v52 = vadd.f32 %v3529_v12, %v3347_v29 }
 0x227   : > { %v1586_v19 = vshrl.u32 %v1527_v35, 16  ;;  %v1589_v54 = vshll.u32 %v1527_v35, 16  ;;  %v1408_v16 = vmax.f32 %v1376_v53, 0.0 }
 0x229   : > { %v1588_v44 = vrot.slane %v1586_v19, 7  ;;  %v1440_v10 = vpack.c.bf16 %v1408_v16, %v1408_v16  ;;  %v1199_v16 = vpop.f32.mrf.mxu3 }
 0x22a   : > { %v1286_v7 = vpop.f32.mrf.mxu2 }
 0x22b   : > { %v1591_v18 = vor.u32 %v1589_v54, %v1588_v44  ;;  %v1341_v58 = vadd.f32 %v1286_v7, %v1187_v33  ;;  %v1703_v1 = vsel %vm2927_vm2, %v1588_v44, 0  ;;  %v1504_v50 = vunpack.c.l.b16 %v1440_v10 }
 0x22c   : > { %v1990_v6 = vrot.slane %v1703_v1, 1  ;;  %v1804_v60 = vshll.u32 %v1703_v1, 16 }
 0x22d   : > { %v1377_v3 = vadd.f32 %v3395_v63, %v1341_v58  ;;  %v3548_v27 = vsel %vm2927_vm2, 0, %v1591_v18 }
 0x22e   : > { %v1989_v4 = vrot.slane %v3548_v27, 1  ;;  %v1799_v25 = vshll.u32 %v3548_v27, 16  ;;  %v1797_v13 = vshrl.u32 %v3548_v27, 16  ;;  %v1806_v59 = vrot.slane %v1804_v60, 1 }
 0x22f   : > { %v1409_v11 = vmax.f32 %v1377_v3, 0.0 }
 0x230   : > { %v1991_v9 = vsel %vm833_vm4, %v1989_v4, %v1990_v6  ;;  %v1801_v23 = vrot.slane %v1799_v25, 1 }
 0x231   : > { %v1441_v14 = vpack.c.bf16 %v1409_v11, %v1409_v11  ;;  %2030 = vrot.lane.b32.xlu1 %v1991_v9, %s2866_s25  ;;  %v1195_v11 = vadd.f32 %v1194_v61, %v3354_v30 }
 0x232   : > { %v1289_v17 = vpop.f32.mrf.mxu2  ;;  %v1802_v20 = vor.u32 %v1801_v23, %v1797_v13 }
 0x233   : > { %v1505_v26 = vunpack.c.l.b16 %v1441_v14  ;;  %v1342_v0 = vadd.f32 %v1289_v17, %v1190_v8 }
 0x234   : > { %v1807_v21 = vsel %vm560_vm3, %v1802_v20, %v1806_v59 }
 0x235   : > { %v1528_v49 = vpack.c.b16 %v1505_v26, %v1504_v50  ;;  %1918 = vrot.lane.b32.xlu0 %v1807_v21, %s2865_s24  ;;  %v1378_v43 = vadd.f32 %v3395_v63, %v1342_v0  ;;  %v1201_v26 = vpop.f32.mrf.mxu3 }
 0x237   : > { %v1593_v28 = vshrl.u32 %v1528_v49, 16  ;;  %v1905_v47 = vpop.permute.xlu1 %1904  ;;  %v1596_v19 = vshll.u32 %v1528_v49, 16  ;;  %v1410_v54 = vmax.f32 %v1378_v43, 0.0 }
 0x238   : > { %v2049_v15 = vsel %vm919_vm6, %v3421_v22, %v1905_v47 }
 0x239   : > { %v1595_v35 = vrot.slane %v1593_v28, 7  ;;  %v2081_v53 = vsel %vm954_vm7, %v2049_v15, %v2017_v41  ;;  %v1442_v4 = vpack.c.bf16 %v1410_v54, %v1410_v54  ;;  %v1197_v28 = vadd.f32 %v1196_v31, %v3356_v32 }
 0x23a   : > { %v1291_v33 = vpop.f32.mrf.mxu2  ;;  %2741 = vmatmul.msk.bf16.vlgmr.msrb.gmra.mxu3 %vm999_vm8, %v2081_v53  ;;  %2762 = vmatmul.msk.bf16.gmra.mxu0 %vm999_vm8, %v2081_v53 }
 0x23b   : > { %v1598_v44 = vor.u32 %v1596_v19, %v1595_v35  ;;  %v1343_v7 = vadd.f32 %v1291_v33, %v1192_v52  ;;  %v1704_v18 = vsel %vm2927_vm2, %v1595_v35, 0  ;;  %v1506_v14 = vunpack.c.l.b16 %v1442_v4 }
 0x23c   : > { %v1993_v58 = vrot.slane %v1704_v18, 1  ;;  %v1816_v3 = vshll.u32 %v1704_v18, 16 }
 0x23d   : > { %v1379_v22 = vadd.f32 %v3395_v63, %v1343_v7  ;;  %v3571_v29 = vsel %vm2927_vm2, 0, %v1598_v44 }
 0x23e   : > { %v1992_v12 = vrot.slane %v3571_v29, 1  ;;  %v1811_v1 = vshll.u32 %v3571_v29, 16  ;;  %v1809_v60 = vshrl.u32 %v3571_v29, 16  ;;  %v1818_v8 = vrot.slane %v1816_v3, 1 }
 0x23f   : > { %v1411_v6 = vmax.f32 %v1379_v22, 0.0  ;;  %v1204_v22 = vpop.f32.mrf.mxu3  ;;  %v1200_v3 = vadd.f32 %v1199_v16, %v3363_v34  ;;  %v1202_v16 = vadd.f32 %v1201_v26, %v3365_v56 }
 0x240   : > { %v1994_v25 = vsel %vm833_vm4, %v1992_v12, %v1993_v58  ;;  %v1813_v10 = vrot.slane %v1811_v1, 1 }
 0x241   : > { %v1443_v9 = vpack.c.bf16 %v1411_v6, %v1411_v6  ;;  %2032 = vrot.lane.b32.xlu0 %v1994_v25, %s2866_s25 }
 0x242   : > { %v1294_v13 = vpop.f32.mrf.mxu2  ;;  %v1814_v23 = vor.u32 %v1813_v10, %v1809_v60 }
 0x243   : > { %v1507_v17 = vunpack.c.l.b16 %v1443_v9  ;;  %v1344_v20 = vadd.f32 %v1294_v13, %v1195_v11  ;;  %v2019_v30 = vpop.permute.xlu1 %2018 }
 0x244   : > { %v1819_v59 = vsel %vm560_vm3, %v1814_v23, %v1818_v8  ;;  %v1909_v23 = vpop.permute.xlu2 %1908 }
 0x245   : > { %v1529_v50 = vpack.c.b16 %v1507_v17, %v1506_v14  ;;  %1920 = vrot.lane.b32.xlu2 %v1819_v59, %s2865_s24  ;;  %v1380_v21 = vadd.f32 %v3395_v63, %v1344_v20  ;;  %v2053_v34 = vsel %vm919_vm6, %v3455_v42, %v1909_v23 }
 0x247   : > { %v1600_v0 = vshrl.u32 %v1529_v50, 16  ;;  %v1907_v49 = vpop.permute.xlu0 %1906  ;;  %v1603_v47 = vshll.u32 %v1529_v50, 16  ;;  %v1412_v35 = vmax.f32 %v1380_v21, 0.0  ;;  %v1206_v21 = vpop.f32.mrf.mxu3 }
 0x248   : > { %v2051_v61 = vsel %vm919_vm6, %v3438_v5, %v1907_v49 }
 0x249   : > { %v1602_v43 = vrot.slane %v1600_v0, 7  ;;  %v2083_v41 = vsel %vm954_vm7, %v2051_v61, %v2019_v30  ;;  %v1444_v7 = vpack.c.bf16 %v1412_v35, %v1412_v35 }
 0x24a   : > { %v1296_v15 = vpop.f32.mrf.mxu2  ;;  %2742 = vmatmul.msk.bf16.gmra.mxu3 %vm999_vm8, %v2083_v41  ;;  %2763 = vmatmul.msk.bf16.gmra.mxu0 %vm999_vm8, %v2083_v41 }
 0x24b   : > { %v1605_v52 = vor.u32 %v1603_v47, %v1602_v43  ;;  %v1345_v19 = vadd.f32 %v1296_v15, %v1197_v28  ;;  %2783 = vmatmul.msk.bf16.vlgmr.msrb.gmra.mxu1 %vm999_vm8, %v2083_v41  ;;  %v1705_v53 = vsel %vm2927_vm2, %v1602_v43, 0  ;;  %v1508_v10 = vunpack.c.l.b16 %v1444_v7 }
 0x24c   : > { %v1996_v33 = vrot.slane %v1705_v53, 1  ;;  %v1828_v54 = vshll.u32 %v1705_v53, 16 }
 0x24d   : > { %v1381_v5 = vadd.f32 %v3395_v63, %v1345_v19  ;;  %v3594_v32 = vsel %vm2927_vm2, 0, %v1605_v52 }
 0x24e   : > { %v1995_v31 = vrot.slane %v3594_v32, 1  ;;  %v1823_v44 = vshll.u32 %v3594_v32, 16  ;;  %v1821_v58 = vshrl.u32 %v3594_v32, 16  ;;  %v1830_v60 = vrot.slane %v1828_v54, 1 }
 0x24f   : > { %v1413_v18 = vmax.f32 %v1381_v5, 0.0 }
 0x250   : > { %v1997_v12 = vsel %vm833_vm4, %v1995_v31, %v1996_v33  ;;  %v1825_v1 = vrot.slane %v1823_v44, 1  ;;  %v1205_v31 = vadd.f32 %v1204_v22, %v3370_v38  ;;  %v2023_v38 = vpop.permute.xlu2 %2022 }
 0x251   : > { %v1445_v4 = vpack.c.bf16 %v1413_v18, %v1413_v18  ;;  %2034 = vrot.lane.b32.xlu2 %v1997_v12, %s2866_s25 }
 0x252   : > { %v1299_v6 = vpop.f32.mrf.mxu2  ;;  %v1826_v25 = vor.u32 %v1825_v1, %v1821_v58  ;;  %v1209_v1 = vpop.f32.mrf.mxu3 }
 0x253   : > { %v1509_v11 = vunpack.c.l.b16 %v1445_v4  ;;  %v1346_v9 = vadd.f32 %v1299_v6, %v1200_v3  ;;  %v2021_v14 = vpop.permute.xlu0 %2020 }
 0x254   : > { %v1831_v13 = vsel %vm560_vm3, %v1826_v25, %v1830_v60  ;;  %v2085_v0 = vsel %vm954_vm7, %v2053_v34, %v2021_v14 }
 0x255   : > { %v1530_v8 = vpack.c.b16 %v1509_v11, %v1508_v10  ;;  %1922 = vrot.lane.b32.xlu1 %v1831_v13, %s2865_s24  ;;  %v1382_v20 = vadd.f32 %v3395_v63, %v1346_v9  ;;  %v1207_v10 = vadd.f32 %v1206_v21, %v3372_v39 }
 0x257   : > { %v1607_v17 = vshrl.u32 %v1530_v8, 16  ;;  %v1610_v50 = vshll.u32 %v1530_v8, 16  ;;  %v1414_v61 = vmax.f32 %v1382_v20, 0.0 }
 0x259   : > { %v1609_v59 = vrot.slane %v1607_v17, 7  ;;  %v1446_v52 = vpack.c.bf16 %v1414_v61, %v1414_v61 }
 0x25a   : > { %v1301_v49 = vpop.f32.mrf.mxu2  ;;  %2743 = vmatmul.msk.bf16.gmra.mxu3 %vm999_vm8, %v2085_v0  ;;  %2764 = vmatmul.msk.bf16.gmra.mxu0 %vm999_vm8, %v2085_v0  ;;  %v1211_v34 = vpop.f32.mrf.mxu3 }
 0x25b   : > { %v1612_v30 = vor.u32 %v1610_v50, %v1609_v59  ;;  %v1347_v28 = vadd.f32 %v1301_v49, %v1202_v16  ;;  %2784 = vmatmul.msk.bf16.gmra.mxu1 %vm999_vm8, %v2085_v0  ;;  %v1706_v42 = vsel %vm2927_vm2, %v1609_v59, 0  ;;  %v1510_v18 = vunpack.c.l.b16 %v1446_v52 }
 0x25c   : > { %v1999_v47 = vrot.slane %v1706_v42, 1  ;;  %v1840_v15 = vshll.u32 %v1706_v42, 16  ;;  %v1210_v42 = vadd.f32 %v1209_v1, %v3375_v2 }
 0x25d   : > { %v1383_v56 = vadd.f32 %v3395_v63, %v1347_v28  ;;  %v3617_v26 = vsel %vm2927_vm2, 0, %v1612_v30 }
 0x25e   : > { %v1998_v43 = vrot.slane %v3617_v26, 1  ;;  %v1835_v41 = vshll.u32 %v3617_v26, 16  ;;  %v1833_v53 = vshrl.u32 %v3617_v26, 16  ;;  %v1842_v7 = vrot.slane %v1840_v15, 1 }
 0x25f   : > { %v1415_v35 = vmax.f32 %v1383_v56, 0.0 }
 0x260   : > { %v2000_v19 = vsel %vm833_vm4, %v1998_v43, %v1999_v47  ;;  %v1837_v5 = vrot.slane %v1835_v41, 1 }
 0x261   : > { %v1447_v33 = vpack.c.bf16 %v1415_v35, %v1415_v35  ;;  %2036 = vrot.lane.b32.xlu1 %v2000_v19, %s2866_s25 }
 0x262   : > { %v1304_v44 = vpop.f32.mrf.mxu2  ;;  %v1838_v54 = vor.u32 %v1837_v5, %v1833_v53 }
 0x263   : > { %v1511_v12 = vunpack.c.l.b16 %v1447_v33  ;;  %v1348_v58 = vadd.f32 %v1304_v44, %v1205_v31  ;;  %v1214_v44 = vpop.f32.mrf.mxu3 }
 0x264   : > { %v1843_v3 = vsel %vm560_vm3, %v1838_v54, %v1842_v7  ;;  %v1212_v7 = vadd.f32 %v1211_v34, %v3377_v40 }
 0x265   : > { %v1531_v4 = vpack.c.b16 %v1511_v12, %v1510_v18  ;;  %1924 = vrot.lane.b32.xlu0 %v1843_v3, %s2865_s24  ;;  %v1384_v25 = vadd.f32 %v3395_v63, %v1348_v58 }
 0x267   : > { %v1614_v6 = vshrl.u32 %v1531_v4, 16  ;;  %v1911_v60 = vpop.permute.xlu1 %1910  ;;  %v1617_v9 = vshll.u32 %v1531_v4, 16  ;;  %v1416_v14 = vmax.f32 %v1384_v25, 0.0 }
 0x268   : > { %v2055_v22 = vsel %vm919_vm6, %v3472_v24, %v1911_v60 }
 0x269   : > { %v1616_v11 = vrot.slane %v1614_v6, 7  ;;  %v2087_v13 = vsel %vm954_vm7, %v2055_v22, %v2023_v38  ;;  %v1448_v21 = vpack.c.bf16 %v1416_v14, %v1416_v14  ;;  %v1215_v14 = vadd.f32 %v1214_v44, %v3380_v45  ;;  %v2824_v45 = vld [vmem:[%s3930_s2] ss:$0 sm:$0xff] }
 0x26a   : > { %v1306_v23 = vpop.f32.mrf.mxu2  ;;  %2744 = vmatmul.msk.bf16.gmra.mxu3 %vm999_vm8, %v2087_v13  ;;  %2765 = vmatmul.msk.bf16.gmra.mxu0 %vm999_vm8, %v2087_v13 }
 0x26b   : > { %v1619_v8 = vor.u32 %v1617_v9, %v1616_v11  ;;  %v1349_v17 = vadd.f32 %v1306_v23, %v1207_v10  ;;  %2785 = vmatmul.msk.bf16.gmra.mxu1 %vm999_vm8, %v2087_v13  ;;  %v1707_v20 = vsel %vm2927_vm2, %v1616_v11, 0  ;;  %v1512_v15 = vunpack.c.l.b16 %v1448_v21 }
 0x26c   : > { %v2002_v59 = vrot.slane %v1707_v20, 1  ;;  %v1852_v0 = vshll.u32 %v1707_v20, 16 }
 0x26d   : > { %v1385_v24 = vadd.f32 %v3395_v63, %v1349_v17  ;;  %v3640_v39 = vsel %vm2927_vm2, 0, %v1619_v8  ;;  %v1216_v17 = vpop.f32.mrf.mxu3 }
 0x26e   : > { %v2001_v16 = vrot.slane %v3640_v39, 1  ;;  %v1847_v50 = vshll.u32 %v3640_v39, 16  ;;  %v1845_v61 = vshrl.u32 %v3640_v39, 16  ;;  %v1854_v41 = vrot.slane %v1852_v0, 1 }
 0x26f   : > { %v1417_v49 = vmax.f32 %v1385_v24, 0.0  ;;  %v1915_v21 = vpop.permute.xlu2 %1914 }
 0x270   : > { %v2003_v30 = vsel %vm833_vm4, %v2001_v16, %v2002_v59  ;;  %v1849_v28 = vrot.slane %v1847_v50, 1 }
 0x271   : > { %v1449_v56 = vpack.c.bf16 %v1417_v49, %v1417_v49  ;;  %2038 = vrot.lane.b32.xlu0 %v2003_v30, %s2866_s25 }
 0x272   : > { %v1309_v43 = vpop.f32.mrf.mxu2  ;;  %v1850_v47 = vor.u32 %v1849_v28, %v1845_v61 }
 0x273   : > { %v1513_v52 = vunpack.c.l.b16 %v1449_v56  ;;  %v1350_v35 = vadd.f32 %v1309_v43, %v1210_v42  ;;  %v2025_v2 = vpop.permute.xlu1 %2024  ;;  %v2059_v42 = vsel %vm919_vm6, %v3510_v37, %v1915_v21  ;;  %v1217_v56 = vadd.f32 %v1216_v17, %v3382_v46 }
 0x274   : > { %v1855_v19 = vsel %vm560_vm3, %v1850_v47, %v1854_v41 }
 0x275   : > { %v1532_v53 = vpack.c.b16 %v1513_v52, %v1512_v15  ;;  %1926 = vrot.lane.b32.xlu2 %v1855_v19, %s2865_s24  ;;  %v1386_v31 = vadd.f32 %v3395_v63, %v1350_v35  ;;  %v1219_v37 = vpop.f32.mrf.mxu3 }
 0x277   : > { %v1621_v5 = vshrl.u32 %v1532_v53, 16  ;;  %v1913_v33 = vpop.permute.xlu0 %1912  ;;  %v1624_v12 = vshll.u32 %v1532_v53, 16  ;;  %v1418_v4 = vmax.f32 %v1386_v31, 0.0 }
 0x278   : > { %v2057_v54 = vsel %vm919_vm6, %v3489_v62, %v1913_v33 }
 0x279   : > { %v1623_v18 = vrot.slane %v1621_v5, 7  ;;  %v2089_v58 = vsel %vm954_vm7, %v2057_v54, %v2025_v2  ;;  %v1450_v11 = vpack.c.bf16 %v1418_v4, %v1418_v4 }
 0x27a   : > { %v1311_v1 = vpop.f32.mrf.mxu2  ;;  %2745 = vmatmul.msk.bf16.gmra.mxu3 %vm999_vm8, %v2089_v58  ;;  %2766 = vmatmul.msk.bf16.gmra.mxu0 %vm999_vm8, %v2089_v58 }
 0x27b   : > { %v1626_v3 = vor.u32 %v1624_v12, %v1623_v18  ;;  %v1351_v6 = vadd.f32 %v1311_v1, %v1212_v7  ;;  %2786 = vmatmul.msk.bf16.gmra.mxu1 %vm999_vm8, %v2089_v58  ;;  %v1708_v25 = vsel %vm2927_vm2, %v1623_v18, 0  ;;  %v1514_v16 = vunpack.c.l.b16 %v1450_v11 }
 0x27c   : > { %v2005_v38 = vrot.slane %v1708_v25, 1  ;;  %v1864_v10 = vshll.u32 %v1708_v25, 16  ;;  %v1220_v1 = vadd.f32 %v1219_v37, %v3386_v51 }
 0x27d   : > { %v1387_v62 = vadd.f32 %v3395_v63, %v1351_v6  ;;  %v3663_v40 = vsel %vm2927_vm2, 0, %v1626_v3  ;;  %v1221_v11 = vpop.f32.mrf.mxu3 }
 0x27e   : > { %v2004_v60 = vrot.slane %v3663_v40, 1  ;;  %v1859_v22 = vshll.u32 %v3663_v40, 16  ;;  %v1857_v23 = vshrl.u32 %v3663_v40, 16  ;;  %v1866_v34 = vrot.slane %v1864_v10, 1 }
 0x27f   : > { %v1419_v9 = vmax.f32 %v1387_v62, 0.0 }
 0x280   : > { %v2006_v13 = vsel %vm833_vm4, %v2004_v60, %v2005_v38  ;;  %v1861_v8 = vrot.slane %v1859_v22, 1 }
 0x281   : > { %v1451_v63 = vpack.c.bf16 %v1419_v9, %v1419_v9  ;;  %2040 = vrot.lane.b32.xlu2 %v2006_v13, %s2866_s25 }
 0x282   : > { %v1314_v20 = vpop.f32.mrf.mxu2  ;;  %v1862_v24 = vor.u32 %v1861_v8, %v1857_v23  ;;  %v2029_v8 = vpop.permute.xlu2 %2028 }
 0x283   : > { %v1515_v59 = vunpack.c.l.b16 %v1451_v63  ;;  %v1352_v50 = vadd.f32 %v1314_v20, %v1215_v14  ;;  %v2027_v30 = vpop.permute.xlu0 %2026  ;;  %v1222_v14 = vadd.f32 %v1221_v11, %v3388_v55 }
 0x284   : > { %v1867_v0 = vsel %vm560_vm3, %v1862_v24, %v1866_v34  ;;  %v2091_v41 = vsel %vm954_vm7, %v2059_v42, %v2027_v30 }
 0x285   : > { %v1533_v49 = vpack.c.b16 %v1515_v59, %v1514_v16  ;;  %1928 = vrot.lane.b32.xlu1 %v1867_v0, %s2865_s24  ;;  %v1388_v28 = vadd.f32 %v2824_v45, %v1352_v50 }
 0x287   : > { %v1628_v61 = vshrl.u32 %v1533_v49, 16  ;;  %v1631_v47 = vshll.u32 %v1533_v49, 16  ;;  %v1420_v35 = vmax.f32 %v1388_v28, 0.0 }
 0x289   : > { %v1630_v43 = vrot.slane %v1628_v61, 7  ;;  %v1452_v54 = vpack.c.bf16 %v1420_v35, %v1420_v35 }
 0x28a   : > { %v1316_v15 = vpop.f32.mrf.mxu2  ;;  %2746 = vmatmul.msk.bf16.gmra.mxu3 %vm999_vm8, %v2091_v41  ;;  %2767 = vmatmul.msk.bf16.gmra.mxu0 %vm999_vm8, %v2091_v41 }
 0x28b   : > { %v1633_v52 = vor.u32 %v1631_v47, %v1630_v43  ;;  %v1353_v19 = vadd.f32 %v1316_v15, %v1217_v56  ;;  %2787 = vmatmul.msk.bf16.gmra.mxu1 %vm999_vm8, %v2091_v41  ;;  %v1709_v53 = vsel %vm2927_vm2, %v1630_v43, 0  ;;  %v1516_v62 = vunpack.c.l.b16 %v1452_v54 }
 0x28c   : > { %v2008_v33 = vrot.slane %v1709_v53, 1  ;;  %v1876_v2 = vshll.u32 %v1709_v53, 16 }
 0x28d   : > { %v1389_v5 = vadd.f32 %v2824_v45, %v1353_v19  ;;  %v3687_v46 = vsel %vm2927_vm2, 0, %v1633_v52  ;;  %v2263_v19 = vpop.f32.mrf.mxu0 }
 0x28e   : > { %v2007_v31 = vrot.slane %v3687_v46, 1  ;;  %v1871_v44 = vshll.u32 %v3687_v46, 16  ;;  %v1869_v12 = vshrl.u32 %v3687_v46, 16  ;;  %v1878_v25 = vrot.slane %v1876_v2, 1 }
 0x28f   : > { %v1421_v7 = vmax.f32 %v1389_v5, 0.0 }
 0x290   : > { %v2009_v18 = vsel %vm833_vm4, %v2007_v31, %v2008_v33  ;;  %v1873_v58 = vrot.slane %v1871_v44, 1 }
 0x291   : > { %v1453_v3 = vpack.c.bf16 %v1421_v7, %v1421_v7  ;;  %2042 = vrot.lane.b32.xlu1 %v2009_v18, %s2866_s25 }
 0x292   : > { %v1319_v4 = vpop.f32.mrf.mxu2  ;;  %v1874_v6 = vor.u32 %v1873_v58, %v1869_v12 }
 0x293   : > { %v1517_v60 = vunpack.c.l.b16 %v1453_v3  ;;  %v1354_v38 = vadd.f32 %v1319_v4, %v1220_v1 }
 0x294   : > { %v1879_v22 = vsel %vm560_vm3, %v1874_v6, %v1878_v25 }
 0x295   : > { %v1534_v10 = vpack.c.b16 %v1517_v60, %v1516_v62  ;;  %1930 = vrot.lane.b32.xlu0 %v1879_v22, %s2865_s24  ;;  %v1390_v13 = vadd.f32 %v2824_v45, %v1354_v38  ;;  %v2265_v4 = vpop.f32.mrf.mxu0 }
 0x297   : > { %v1635_v9 = vshrl.u32 %v1534_v10, 16  ;;  %v1917_v23 = vpop.permute.xlu1 %1916  ;;  %v1638_v17 = vshll.u32 %v1534_v10, 16  ;;  %v1422_v16 = vmax.f32 %v1390_v13, 0.0 }
 0x298   : > { %v2061_v51 = vsel %vm919_vm6, %v3527_v57, %v1917_v23 }
 0x299   : > { %v1637_v63 = vrot.slane %v1635_v9, 7  ;;  %v2093_v20 = vsel %vm954_vm7, %v2061_v51, %v2029_v8  ;;  %v1454_v61 = vpack.c.bf16 %v1422_v16, %v1422_v16 }
 0x29a   : > { %v1321_v24 = vpop.f32.mrf.mxu2  ;;  %2747 = vmatmul.msk.bf16.gmra.mxu3 %vm999_vm8, %v2093_v20  ;;  %2768 = vmatmul.msk.bf16.gmra.mxu0 %vm999_vm8, %v2093_v20 }
 0x29b   : > { %v1640_v34 = vor.u32 %v1638_v17, %v1637_v63  ;;  %v1355_v59 = vadd.f32 %v1321_v24, %v1222_v14  ;;  %2788 = vmatmul.msk.bf16.gmra.mxu1 %vm999_vm8, %v2093_v20  ;;  %v1710_v50 = vsel %vm2927_vm2, %v1637_v63, 0  ;;  %v1518_v15 = vunpack.c.l.b16 %v1454_v61  ;;  %v3745_v17 = vld [vmem:[%s3932_s4] ss:$0 sm:$0xff] }
 0x29c   : > { %v2011_v21 = vrot.slane %v1710_v50, 1  ;;  %v1888_v30 = vshll.u32 %v1710_v50, 16 }
 0x29d   : > { %v1391_v57 = vadd.f32 %v2824_v45, %v1355_v59  ;;  %v3708_v55 = vsel %vm2927_vm2, 0, %v1640_v34 }
 0x29e   : > { %v2010_v0 = vrot.slane %v3708_v55, 1  ;;  %v1883_v49 = vshll.u32 %v3708_v55, 16  ;;  %v1881_v56 = vshrl.u32 %v3708_v55, 16  ;;  %v1890_v41 = vrot.slane %v1888_v30, 1 }
 0x29f   : > { %v1423_v28 = vmax.f32 %v1391_v57, 0.0  ;;  %v1921_v22 = vpop.permute.xlu2 %1920  ;;  %v2825_v57 = vld [vmem:[%s2914_s23] sm:$0xff] }
 0x2a0   : > { %v2012_v42 = vsel %vm833_vm4, %v2010_v0, %v2011_v21  ;;  %v1885_v43 = vrot.slane %v1883_v49, 1  ;;  %v2065_v9 = vsel %vm919_vm6, %v3571_v29, %v1921_v22 }
 0x2a1   : > { %v1455_v47 = vpack.c.bf16 %v1423_v28, %v1423_v28  ;;  %2044 = vrot.lane.b32.xlu0 %v2012_v42, %s2866_s25 }
 0x2a2   : > { %v1886_v45 = vor.u32 %v1885_v43, %v1881_v56  ;;  %v2826_v56 = vld [vmem:[%s2914_s23 + $0x8] sm:$0xff] }
 0x2a3   : > { %v1519_v52 = vunpack.c.l.b16 %v1455_v47  ;;  %v2031_v31 = vpop.permute.xlu1 %2030 }
 0x2a4   : > { %v1891_v35 = vsel %vm560_vm3, %v1886_v45, %v1890_v41 }
 0x2a5   : > { %v1535_v53 = vpack.c.b16 %v1519_v52, %v1518_v15  ;;  %1932 = vrot.lane.b32.xlu2 %v1891_v35, %s2865_s24 }
 0x2a7   : > { %v1642_v37 = vshrl.u32 %v1535_v53, 16  ;;  %v1919_v5 = vpop.permute.xlu0 %1918  ;;  %v1645_v2 = vshll.u32 %v1535_v53, 16 }
 0x2a8   : > { %v2063_v33 = vsel %vm919_vm6, %v3548_v27, %v1919_v5 }
 0x2a9   : > { %v1644_v44 = vrot.slane %v1642_v37, 7  ;;  %v2095_v54 = vsel %vm954_vm7, %v2063_v33, %v2031_v31  ;;  %v2827_v33 = vld [vmem:[%s2914_s23 + $0x10] sm:$0xff] }
 0x2aa   : > { %2748 = vmatmul.msk.bf16.gmra.mxu3 %vm999_vm8, %v2095_v54  ;;  %2769 = vmatmul.msk.bf16.gmra.mxu0 %vm999_vm8, %v2095_v54 }
 0x2ab   : > { %v1647_v7 = vor.u32 %v1645_v2, %v1644_v44  ;;  %2789 = vmatmul.msk.bf16.gmra.mxu1 %vm999_vm8, %v2095_v54  ;;  %v1711_v18 = vsel %vm2927_vm2, %v1644_v44, 0  ;;  %v2035_v20 = vpop.permute.xlu2 %2034 }
 0x2ac   : > { %v2014_v58 = vrot.slane %v1711_v18, 1  ;;  %v1900_v3 = vshll.u32 %v1711_v18, 16 }
 0x2ad   : > { %v3727_v12 = vsel %vm2927_vm2, 0, %v1647_v7 }
 0x2ae   : > { %v2013_v27 = vrot.slane %v3727_v12, 1  ;;  %v1895_v1 = vshll.u32 %v3727_v12, 16  ;;  %v1893_v25 = vshrl.u32 %v3727_v12, 16  ;;  %v1902_v38 = vrot.slane %v1900_v3, 1  ;;  %v2828_v3 = vld [vmem:[%s2914_s23 + $0x18] sm:$0xff] }
 0x2b0   : > { %v2015_v6 = vsel %vm833_vm4, %v2013_v27, %v2014_v58  ;;  %v1897_v62 = vrot.slane %v1895_v1, 1 }
 0x2b1   : > { %2046 = vrot.lane.b32.xlu2 %v2015_v6, %s2866_s25 }
 0x2b2   : > { %v1898_v60 = vor.u32 %v1897_v62, %v1893_v25 }
 0x2b3   : > { %v2033_v10 = vpop.permute.xlu0 %2032 }
 0x2b4   : > { %v1903_v36 = vsel %vm560_vm3, %v1898_v60, %v1902_v38  ;;  %v2097_v13 = vsel %vm954_vm7, %v2065_v9, %v2033_v10 }
 0x2b5   : > { %1934 = vrot.lane.b32.xlu1 %v1903_v36, %s2865_s24 }
 0x2b7   : > { %v2268_v11 = vpop.f32.mrf.mxu0 }
 0x2ba   : > { %2749 = vmatmul.msk.bf16.gmra.mxu3 %vm999_vm8, %v2097_v13  ;;  %2770 = vmatmul.msk.bf16.gmra.mxu0 %vm999_vm8, %v2097_v13 }
 0x2bb   : > { %2790 = vmatmul.msk.bf16.gmra.mxu1 %vm999_vm8, %v2097_v13  ;;  %v2829_v13 = vld [vmem:[%s2914_s23 + $0x20] sm:$0xff] }
 0x2bd   : > { %v2166_v23 = vpop.f32.mrf.mxu3 }
 0x2be   : > { %v2264_v14 = vadd.f32 %v2263_v19, %v2166_v23 }
 0x2bf   : > { %v2270_v8 = vpop.f32.mrf.mxu0 }
 0x2c5   : > { %v2168_v51 = vpop.f32.mrf.mxu3 }
 0x2c7   : > { %v2273_v63 = vpop.f32.mrf.mxu0  ;;  %v1923_v29 = vpop.permute.xlu1 %1922 }
 0x2c8   : > { %v2363_v24 = vpop.f32.mrf.mxu1  ;;  %v2067_v34 = vsel %vm919_vm6, %v3594_v32, %v1923_v29  ;;  %v2266_v32 = vadd.f32 %v2265_v4, %v2168_v51 }
 0x2c9   : > { %v2443_v16 = vadd.f32 %v2363_v24, %v2264_v14  ;;  %v2099_v59 = vsel %vm954_vm7, %v2067_v34, %v2035_v20  ;;  %v2830_v24 = vld [vmem:[%s2914_s23 + $0x28] sm:$0xff] }
 0x2ca   : > { %2750 = vmatmul.msk.bf16.gmra.mxu3 %vm999_vm8, %v2099_v59  ;;  %2771 = vmatmul.msk.bf16.gmra.mxu0 %vm999_vm8, %v2099_v59 }
 0x2cb   : > { %v2479_v50 = vadd.f32 %v3745_v17, %v2443_v16  ;;  %2791 = vmatmul.msk.bf16.gmra.mxu1 %vm999_vm8, %v2099_v59 }
 0x2cd   : > { %v2511_v0 = vadd.f32 %v2825_v57, %v2479_v50  ;;  %v2171_v21 = vpop.f32.mrf.mxu3 }
 0x2ce   : > { %v2269_v45 = vadd.f32 %v2268_v11, %v2171_v21 }
 0x2cf   : > { %v2543_v49 = vmax.f32 %v2511_v0, 0.0  ;;  %v2275_v30 = vpop.f32.mrf.mxu0  ;;  %v1927_v1 = vpop.permute.xlu2 %1926 }
 0x2d0   : > { %v2365_v61 = vpop.f32.mrf.mxu1  ;;  %v2071_v36 = vsel %vm919_vm6, %v3640_v39, %v1927_v1 }
 0x2d1   : > { %2575 = vst.msk [vmem:[%s3760_s12] sm:$0xff] %vm919_vm6, %v2543_v49  ;;  %v2444_v28 = vadd.f32 %v2365_v61, %v2266_v32 }
 0x2d3   : > { %v2480_v42 = vadd.f32 %v3745_v17, %v2444_v28  ;;  %v2037_v35 = vpop.permute.xlu1 %2036 }
 0x2d5   : > { %v2512_v43 = vadd.f32 %v2826_v56, %v2480_v42  ;;  %v2173_v47 = vpop.f32.mrf.mxu3  ;;  %v2831_v42 = vld [vmem:[%s2914_s23 + $0x30] sm:$0xff] }
 0x2d7   : > { %v2544_v41 = vmax.f32 %v2512_v43, 0.0  ;;  %v1925_v15 = vpop.permute.xlu0 %1924  ;;  %v2278_v52 = vpop.f32.mrf.mxu0 }
 0x2d8   : > { %v2069_v19 = vsel %vm919_vm6, %v3617_v26, %v1925_v15  ;;  %v2368_v53 = vpop.f32.mrf.mxu1  ;;  %v2271_v26 = vadd.f32 %v2270_v8, %v2173_v47 }
 0x2d9   : > { %2576 = vst.msk [vmem:[%s3760_s12 + $0x8] sm:$0xff] %vm919_vm6, %v2544_v41  ;;  %v2445_v37 = vadd.f32 %v2368_v53, %v2269_v45  ;;  %v2101_v5 = vsel %vm954_vm7, %v2069_v19, %v2037_v35  ;;  %v2832_v35 = vld [vmem:[%s2914_s23 + $0x38] sm:$0xff] }
 0x2da   : > { %2751 = vmatmul.msk.bf16.gmra.mxu3 %vm999_vm8, %v2101_v5  ;;  %2772 = vmatmul.msk.bf16.gmra.mxu0 %vm999_vm8, %v2101_v5 }
 0x2db   : > { %v2481_v31 = vadd.f32 %v3745_v17, %v2445_v37  ;;  %2792 = vmatmul.msk.bf16.gmra.mxu1 %vm999_vm8, %v2101_v5  ;;  %v2041_v21 = vpop.permute.xlu2 %2040 }
 0x2dd   : > { %v2513_v44 = vadd.f32 %v2827_v33, %v2481_v31  ;;  %v2176_v2 = vpop.f32.mrf.mxu3 }
 0x2de   : > { %v2274_v62 = vadd.f32 %v2273_v63, %v2176_v2 }
 0x2df   : > { %v2545_v54 = vmax.f32 %v2513_v44, 0.0  ;;  %v2280_v7 = vpop.f32.mrf.mxu0 }
 0x2e0   : > { %v2370_v18 = vpop.f32.mrf.mxu1 }
 0x2e1   : > { %2577 = vst.msk [vmem:[%s3760_s12 + $0x10] sm:$0xff] %vm919_vm6, %v2545_v54  ;;  %v2446_v27 = vadd.f32 %v2370_v18, %v2271_v26 }
 0x2e3   : > { %v2482_v58 = vadd.f32 %v3745_v17, %v2446_v27  ;;  %v2039_v25 = vpop.permute.xlu0 %2038  ;;  %v2833_v27 = vld [vmem:[%s2914_s23 + $0x40] sm:$0xff] }
 0x2e4   : > { %v2103_v10 = vsel %vm954_vm7, %v2071_v36, %v2039_v25 }
 0x2e5   : > { %v2514_v4 = vadd.f32 %v2828_v3, %v2482_v58  ;;  %v2178_v6 = vpop.f32.mrf.mxu3 }
 0x2e6   : > { %v2276_v39 = vadd.f32 %v2275_v30, %v2178_v6 }
 0x2e7   : > { %v2546_v60 = vmax.f32 %v2514_v4, 0.0  ;;  %v2283_v38 = vpop.f32.mrf.mxu0 }
 0x2e8   : > { %v2373_v22 = vpop.f32.mrf.mxu1 }
 0x2e9   : > { %2578 = vst.msk [vmem:[%s3760_s12 + $0x18] sm:$0xff] %vm919_vm6, %v2546_v60  ;;  %v2447_v11 = vadd.f32 %v2373_v22, %v2274_v62 }
 0x2ea   : > { %2752 = vmatmul.msk.bf16.gmra.mxu3 %vm999_vm8, %v2103_v10  ;;  %2773 = vmatmul.msk.bf16.gmra.mxu0 %vm999_vm8, %v2103_v10 }
 0x2eb   : > { %v2483_v9 = vadd.f32 %v3745_v17, %v2447_v11  ;;  %2793 = vmatmul.msk.bf16.gmra.mxu1 %vm999_vm8, %v2103_v10 }
 0x2ed   : > { %v2515_v23 = vadd.f32 %v2829_v13, %v2483_v9  ;;  %v2181_v8 = vpop.f32.mrf.mxu3 }
 0x2ee   : > { %v2279_v59 = vadd.f32 %v2278_v52, %v2181_v8 }
 0x2ef   : > { %v2547_v51 = vmax.f32 %v2515_v23, 0.0  ;;  %v2285_v14 = vpop.f32.mrf.mxu0 }
 0x2f0   : > { %v2375_v63 = vpop.f32.mrf.mxu1 }
 0x2f1   : > { %2579 = vst.msk [vmem:[%s3760_s12 + $0x20] sm:$0xff] %vm919_vm6, %v2547_v51  ;;  %v2448_v29 = vadd.f32 %v2375_v63, %v2276_v39  ;;  %v2835_v63 = vld [vmem:[%s2914_s23 + $0x50] sm:$0xff] }
 0x2f3   : > { %v2484_v20 = vadd.f32 %v3745_v17, %v2448_v29 }
 0x2f5   : > { %v2516_v34 = vadd.f32 %v2830_v24, %v2484_v20  ;;  %v2183_v16 = vpop.f32.mrf.mxu3 }
 0x2f6   : > { %v2281_v47 = vadd.f32 %v2280_v7, %v2183_v16 }
 0x2f7   : > { %v2548_v50 = vmax.f32 %v2516_v34, 0.0  ;;  %v2288_v57 = vpop.f32.mrf.mxu0  ;;  %v1929_v0 = vpop.permute.xlu1 %1928 }
 0x2f8   : > { %v2378_v32 = vpop.f32.mrf.mxu1  ;;  %v2073_v49 = vsel %vm919_vm6, %v3663_v40, %v1929_v0 }
 0x2f9   : > { %2580 = vst.msk [vmem:[%s3760_s12 + $0x28] sm:$0xff] %vm919_vm6, %v2548_v50  ;;  %v2449_v30 = vadd.f32 %v2378_v32, %v2279_v59  ;;  %v2105_v61 = vsel %vm954_vm7, %v2073_v49, %v2041_v21 }
 0x2fa   : > { %2753 = vmatmul.msk.bf16.gmra.mxu3 %vm999_vm8, %v2105_v61  ;;  %2774 = vmatmul.msk.bf16.gmra.mxu0 %vm999_vm8, %v2105_v61 }
 0x2fb   : > { %v2485_v28 = vadd.f32 %v3745_v17, %v2449_v30  ;;  %2794 = vmatmul.msk.bf16.gmra.mxu1 %vm999_vm8, %v2105_v61 }
 0x2fd   : > { %v2517_v56 = vadd.f32 %v2831_v42, %v2485_v28  ;;  %v2186_v43 = vpop.f32.mrf.mxu3 }
 0x2fe   : > { %v2284_v37 = vadd.f32 %v2283_v38, %v2186_v43  ;;  %v2834_v38 = vld [vmem:[%s2914_s23 + $0x48] sm:$0xff] }
 0x2ff   : > { %v2549_v45 = vmax.f32 %v2517_v56, 0.0  ;;  %v2290_v40 = vpop.f32.mrf.mxu0  ;;  %v1933_v60 = vpop.permute.xlu2 %1932 }
 0x300   : > { %v2380_v41 = vpop.f32.mrf.mxu1  ;;  %v2077_v23 = vsel %vm919_vm6, %v3708_v55, %v1933_v60 }
 0x301   : > { %2581 = vst.msk [vmem:[%s3760_s12 + $0x30] sm:$0xff] %vm919_vm6, %v2549_v45  ;;  %v2450_v15 = vadd.f32 %v2380_v41, %v2281_v47 }
 0x303   : > { %v2486_v52 = vadd.f32 %v3745_v17, %v2450_v15  ;;  %v2043_v44 = vpop.permute.xlu1 %2042 }
 0x305   : > { %v2518_v19 = vadd.f32 %v2832_v35, %v2486_v52  ;;  %v2188_v53 = vpop.f32.mrf.mxu3 }
 0x307   : > { %v2550_v5 = vmax.f32 %v2518_v19, 0.0  ;;  %v1931_v31 = vpop.permute.xlu0 %1930  ;;  %v2293_v33 = vpop.f32.mrf.mxu0 }
 0x308   : > { %v2075_v2 = vsel %vm919_vm6, %v3687_v46, %v1931_v31  ;;  %v2383_v26 = vpop.f32.mrf.mxu1  ;;  %v2286_v46 = vadd.f32 %v2285_v14, %v2188_v53 }
 0x309   : > { %2582 = vst.msk [vmem:[%s3760_s12 + $0x38] sm:$0xff] %vm919_vm6, %v2550_v5  ;;  %v2451_v54 = vadd.f32 %v2383_v26, %v2284_v37  ;;  %v2107_v7 = vsel %vm954_vm7, %v2075_v2, %v2043_v44  ;;  %v2838_v5 = vld [vmem:[%s2914_s23 + $0x68] sm:$0xff] }
 0x30a   : > { %2754 = vmatmul.msk.bf16.gmra.mxu3 %vm999_vm8, %v2107_v7  ;;  %2775 = vmatmul.msk.bf16.gmra.mxu0 %vm999_vm8, %v2107_v7 }
 0x30b   : > { %v2487_v18 = vadd.f32 %v3745_v17, %v2451_v54  ;;  %2795 = vmatmul.msk.bf16.gmra.mxu1 %vm999_vm8, %v2107_v7  ;;  %v2047_v32 = vpop.permute.xlu2 %2046 }
 0x30d   : > { %v2519_v58 = vadd.f32 %v2833_v27, %v2487_v18  ;;  %v2191_v1 = vpop.f32.mrf.mxu3  ;;  %v2839_v27 = vld [vmem:[%s2914_s23 + $0x70] sm:$0xff] }
 0x30e   : > { %v2289_v11 = vadd.f32 %v2288_v57, %v2191_v1  ;;  %v2836_v57 = vld [vmem:[%s2914_s23 + $0x58] sm:$0xff] }
 0x30f   : > { %v2551_v3 = vmax.f32 %v2519_v58, 0.0  ;;  %v2295_v4 = vpop.f32.mrf.mxu0 }
 0x310   : > { %v2385_v6 = vpop.f32.mrf.mxu1 }
 0x311   : > { %2583 = vst.msk [vmem:[%s3760_s12 + $0x40] sm:$0xff] %vm919_vm6, %v2551_v3  ;;  %v2452_v25 = vadd.f32 %v2385_v6, %v2286_v46 }
 0x313   : > { %v2488_v62 = vadd.f32 %v3745_v17, %v2452_v25  ;;  %v2045_v10 = vpop.permute.xlu0 %2044 }
 0x314   : > { %v2109_v39 = vsel %vm954_vm7, %v2077_v23, %v2045_v10 }
 0x315   : > { %v2520_v36 = vadd.f32 %v2834_v38, %v2488_v62  ;;  %v2193_v22 = vpop.f32.mrf.mxu3  ;;  %v2840_v62 = vld [vmem:[%s2914_s23 + $0x78] sm:$0xff] }
 0x316   : > { %v2291_v55 = vadd.f32 %v2290_v40, %v2193_v22  ;;  %v2837_v40 = vld [vmem:[%s2914_s23 + $0x60] sm:$0xff] }
 0x317   : > { %v2552_v9 = vmax.f32 %v2520_v36, 0.0  ;;  %v2298_v13 = vpop.f32.mrf.mxu0 }
 0x318   : > { %v2388_v8 = vpop.f32.mrf.mxu1 }
 0x319   : > { %2584 = vst.msk [vmem:[%s3760_s12 + $0x48] sm:$0xff] %vm919_vm6, %v2552_v9  ;;  %v2453_v51 = vadd.f32 %v2388_v8, %v2289_v11 }
 0x31a   : > { %2755 = vmatmul.msk.bf16.gmra.mxu3 %vm999_vm8, %v2109_v39  ;;  %2776 = vmatmul.msk.bf16.gmra.mxu0 %vm999_vm8, %v2109_v39 }
 0x31b   : > { %v2489_v14 = vadd.f32 %v3745_v17, %v2453_v51  ;;  %2796 = vmatmul.msk.bf16.gmra.mxu1 %vm999_vm8, %v2109_v39 }
 0x31d   : > { %v2521_v29 = vadd.f32 %v2835_v63, %v2489_v14  ;;  %v2196_v20 = vpop.f32.mrf.mxu3 }
 0x31e   : > { %v2294_v49 = vadd.f32 %v2293_v33, %v2196_v20 }
 0x31f   : > { %v2553_v24 = vmax.f32 %v2521_v29, 0.0  ;;  %v2300_v34 = vpop.f32.mrf.mxu0 }
 0x320   : > { %v2390_v16 = vpop.f32.mrf.mxu1 }
 0x321   : > { %2585 = vst.msk [vmem:[%s3760_s12 + $0x50] sm:$0xff] %vm919_vm6, %v2553_v24  ;;  %v2454_v59 = vadd.f32 %v2390_v16, %v2291_v55  ;;  %v2842_v55 = vld [vmem:[%s2914_s23 + $0x88] sm:$0xff] }
 0x323   : > { %v2490_v50 = vadd.f32 %v3745_v17, %v2454_v59 }
 0x325   : > { %v2522_v0 = vadd.f32 %v2836_v57, %v2490_v50  ;;  %v2198_v21 = vpop.f32.mrf.mxu3 }
 0x326   : > { %v2296_v52 = vadd.f32 %v2295_v4, %v2198_v21 }
 0x327   : > { %v2554_v30 = vmax.f32 %v2522_v0, 0.0  ;;  %v1935_v61 = vpop.permute.xlu1 %1934  ;;  %v2303_v28 = vpop.f32.mrf.mxu0 }
 0x328   : > { %v2393_v42 = vpop.f32.mrf.mxu1  ;;  %v2079_v56 = vsel %vm919_vm6, %v3727_v12, %v1935_v61 }
 0x329   : > { %2586 = vst.msk [vmem:[%s3760_s12 + $0x58] sm:$0xff] %vm919_vm6, %v2554_v30  ;;  %v2455_v43 = vadd.f32 %v2393_v42, %v2294_v49  ;;  %v2111_v47 = vsel %vm954_vm7, %v2079_v56, %v2047_v32  ;;  %v2843_v32 = vld [vmem:[%s2914_s23 + $0x90] sm:$0xff] }
 0x32a   : > { %2756 = vmatmul.msk.bf16.gmra.mxu3 %vm999_vm8, %v2111_v47 }
 0x32b   : > { %v2491_v45 = vadd.f32 %v3745_v17, %v2455_v43  ;;  %2797 = vmatmul.msk.bf16.gmra.mxu1 %vm999_vm8, %v2111_v47 }
 0x32d   : > { %v2523_v41 = vadd.f32 %v2837_v40, %v2491_v45  ;;  %v2201_v15 = vpop.f32.mrf.mxu3  ;;  %v2844_v45 = vld [vmem:[%s2914_s23 + $0x98] sm:$0xff] }
 0x32e   : > { %v2299_v44 = vadd.f32 %v2298_v13, %v2201_v15  ;;  %v2841_v13 = vld [vmem:[%s2914_s23 + $0x80] sm:$0xff] }
 0x32f   : > { %v2555_v35 = vmax.f32 %v2523_v41, 0.0  ;;  %v2305_v53 = vpop.f32.mrf.mxu0 }
 0x330   : > { %v2395_v19 = vpop.f32.mrf.mxu1 }
 0x331   : > { %2587 = vst.msk [vmem:[%s3760_s12 + $0x60] sm:$0xff] %vm919_vm6, %v2555_v35  ;;  %v2456_v12 = vadd.f32 %v2395_v19, %v2296_v52 }
 0x333   : > { %v2492_v37 = vadd.f32 %v3745_v17, %v2456_v12 }
 0x335   : > { %v2524_v31 = vadd.f32 %v2838_v5, %v2492_v37  ;;  %v2203_v33 = vpop.f32.mrf.mxu3 }
 0x336   : > { %v2301_v46 = vadd.f32 %v2300_v34, %v2203_v33 }
 0x337   : > { %v2556_v2 = vmax.f32 %v2524_v31, 0.0  ;;  %v2308_v18 = vpop.f32.mrf.mxu0 }
 0x338   : > { %v2398_v26 = vpop.f32.mrf.mxu1 }
 0x339   : > { %2588 = vst.msk [vmem:[%s3760_s12 + $0x68] sm:$0xff] %vm919_vm6, %v2556_v2  ;;  %v2457_v54 = vadd.f32 %v2398_v26, %v2299_v44 }
 0x33b   : > { %v2493_v7 = vadd.f32 %v3745_v17, %v2457_v54  ;;  %2798 = vmatmul.msk.bf16.gmra.mxu1 %vm999_vm8, %v3249_v48 }
 0x33d   : > { %v2525_v58 = vadd.f32 %v2839_v27, %v2493_v7  ;;  %v2206_v1 = vpop.f32.mrf.mxu3  ;;  %v2846_v7 = vld [vmem:[%s2914_s23 + $0xa8] sm:$0xff] }
 0x33e   : > { %v2304_v48 = vadd.f32 %v2303_v28, %v2206_v1 }
 0x33f   : > { %v2557_v3 = vmax.f32 %v2525_v58, 0.0  ;;  %v2310_v36 = vpop.f32.mrf.mxu0 }
 0x340   : > { %v2400_v4 = vpop.f32.mrf.mxu1 }
 0x341   : > { %2589 = vst.msk [vmem:[%s3760_s12 + $0x70] sm:$0xff] %vm919_vm6, %v2557_v3  ;;  %v2458_v6 = vadd.f32 %v2400_v4, %v2301_v46 }
 0x343   : > { %v2494_v25 = vadd.f32 %v3745_v17, %v2458_v6 }
 0x345   : > { %v2526_v60 = vadd.f32 %v2840_v62, %v2494_v25  ;;  %v2208_v38 = vpop.f32.mrf.mxu3  ;;  %v2847_v25 = vld [vmem:[%s2914_s23 + $0xb0] sm:$0xff] }
 0x346   : > { %v2306_v39 = vadd.f32 %v2305_v53, %v2208_v38  ;;  %v2845_v53 = vld [vmem:[%s2914_s23 + $0xa0] sm:$0xff] }
 0x347   : > { %v2558_v22 = vmax.f32 %v2526_v60, 0.0  ;;  %v2313_v14 = vpop.f32.mrf.mxu0 }
 0x348   : > { %v2403_v10 = vpop.f32.mrf.mxu1 }
 0x349   : > { %2590 = vst.msk [vmem:[%s3760_s12 + $0x78] sm:$0xff] %vm919_vm6, %v2558_v22  ;;  %v2459_v11 = vadd.f32 %v2403_v10, %v2304_v48 }
 0x34b   : > { %v2495_v9 = vadd.f32 %v3745_v17, %v2459_v11 }
 0x34d   : > { %v2527_v23 = vadd.f32 %v2841_v13, %v2495_v9  ;;  %v2211_v8 = vpop.f32.mrf.mxu3  ;;  %v2848_v9 = vld [vmem:[%s2914_s23 + $0xb8] sm:$0xff] }
 0x34e   : > { %v2309_v16 = vadd.f32 %v2308_v18, %v2211_v8 }
 0x34f   : > { %v2559_v51 = vmax.f32 %v2527_v23, 0.0  ;;  %v2315_v0 = vpop.f32.mrf.mxu0 }
 0x350   : > { %v2405_v63 = vpop.f32.mrf.mxu1 }
 0x351   : > { %2591 = vst.msk [vmem:[%s3760_s12 + $0x80] sm:$0xff] %vm919_vm6, %v2559_v51  ;;  %v2460_v29 = vadd.f32 %v2405_v63, %v2306_v39 }
 0x353   : > { %v2496_v20 = vadd.f32 %v3745_v17, %v2460_v29 }
 0x355   : > { %v2528_v24 = vadd.f32 %v2842_v55, %v2496_v20  ;;  %v2213_v34 = vpop.f32.mrf.mxu3  ;;  %v2849_v20 = vld [vmem:[%s2914_s23 + $0xc0] sm:$0xff] }
 0x356   : > { %v2311_v61 = vadd.f32 %v2310_v36, %v2213_v34 }
 0x357   : > { %v2560_v59 = vmax.f32 %v2528_v24, 0.0  ;;  %v2318_v47 = vpop.f32.mrf.mxu0 }
 0x358   : > { %v2408_v50 = vpop.f32.mrf.mxu1 }
 0x359   : > { %2592 = vst.msk [vmem:[%s3760_s12 + $0x88] sm:$0xff] %vm919_vm6, %v2560_v59  ;;  %v2461_v57 = vadd.f32 %v2408_v50, %v2309_v16 }
 0x35b   : > { %v2497_v21 = vadd.f32 %v3745_v17, %v2461_v57 }
 0x35d   : > { %v2529_v49 = vadd.f32 %v2843_v32, %v2497_v21  ;;  %v2216_v30 = vpop.f32.mrf.mxu3 }
 0x35e   : > { %v2314_v15 = vadd.f32 %v2313_v14, %v2216_v30 }
 0x35f   : > { %v2561_v28 = vmax.f32 %v2529_v49, 0.0  ;;  %v2320_v31 = vpop.f32.mrf.mxu0 }
 0x360   : > { %v2410_v42 = vpop.f32.mrf.mxu1 }
 0x361   : > { %2593 = vst.msk [vmem:[%s3760_s12 + $0x90] sm:$0xff] %vm919_vm6, %v2561_v28  ;;  %v2462_v56 = vadd.f32 %v2410_v42, %v2311_v61 }
 0x363   : > { %v2498_v43 = vadd.f32 %v3745_v17, %v2462_v56 }
 0x365   : > { %v2530_v40 = vadd.f32 %v2844_v45, %v2498_v43  ;;  %v2218_v41 = vpop.f32.mrf.mxu3  ;;  %v2851_v43 = vld [vmem:[%s2914_s23 + $0xd0] sm:$0xff] }
 0x366   : > { %v2316_v33 = vadd.f32 %v2315_v0, %v2218_v41  ;;  %v2850_v0 = vld [vmem:[%s2914_s23 + $0xc8] sm:$0xff] }
 0x367   : > { %v2562_v52 = vmax.f32 %v2530_v40, 0.0  ;;  %v2323_v46 = vpop.f32.mrf.mxu0 }
 0x368   : > { %v2413_v35 = vpop.f32.mrf.mxu1 }
 0x369   : > { %2594 = vst.msk [vmem:[%s3760_s12 + $0x98] sm:$0xff] %vm919_vm6, %v2562_v52  ;;  %v2463_v19 = vadd.f32 %v2413_v35, %v2314_v15 }
 0x36b   : > { %v2499_v12 = vadd.f32 %v3745_v17, %v2463_v19 }
 0x36d   : > { %v2531_v37 = vadd.f32 %v2845_v53, %v2499_v12  ;;  %v2221_v5 = vpop.f32.mrf.mxu3  ;;  %v2852_v12 = vld [vmem:[%s2914_s23 + $0xd8] sm:$0xff] }
 0x36e   : > { %v2319_v58 = vadd.f32 %v2318_v47, %v2221_v5 }
 0x36f   : > { %v2563_v44 = vmax.f32 %v2531_v37, 0.0  ;;  %v2325_v10 = vpop.f32.mrf.mxu0 }
 0x370   : > { %v2415_v2 = vpop.f32.mrf.mxu1 }
 0x371   : > { %2595 = vst.msk [vmem:[%s3760_s12 + $0xa0] sm:$0xff] %vm919_vm6, %v2563_v44  ;;  %v2464_v26 = vadd.f32 %v2415_v2, %v2316_v33 }
 0x373   : > { %v2500_v54 = vadd.f32 %v3745_v17, %v2464_v26 }
 0x375   : > { %v2532_v18 = vadd.f32 %v2846_v7, %v2500_v54  ;;  %v2223_v27 = vpop.f32.mrf.mxu3  ;;  %v2853_v54 = vld [vmem:[%s2914_s23 + $0xe0] sm:$0xff] }
 0x376   : > { %v2321_v38 = vadd.f32 %v2320_v31, %v2223_v27 }
 0x377   : > { %v2564_v1 = vmax.f32 %v2532_v18, 0.0  ;;  %v2328_v29 = vpop.f32.mrf.mxu0 }
 0x378   : > { %v2418_v3 = vpop.f32.mrf.mxu1 }
 0x379   : > { %2596 = vst.msk [vmem:[%s3760_s12 + $0xa8] sm:$0xff] %vm919_vm6, %v2564_v1  ;;  %v2465_v4 = vadd.f32 %v2418_v3, %v2319_v58 }
 0x37b   : > { %v2501_v6 = vadd.f32 %v3745_v17, %v2465_v4 }
 0x37d   : > { %v2533_v62 = vadd.f32 %v2847_v25, %v2501_v6  ;;  %v2226_v60 = vpop.f32.mrf.mxu3  ;;  %v2854_v6 = vld [vmem:[%s2914_s23 + $0xe8] sm:$0xff] }
 0x37e   : > { %v2324_v8 = vadd.f32 %v2323_v46, %v2226_v60 }
 0x37f   : > { %v2565_v36 = vmax.f32 %v2533_v62, 0.0  ;;  %v2330_v49 = vpop.f32.mrf.mxu0 }
 0x380   : > { %v2420_v48 = vpop.f32.mrf.mxu1 }
 0x381   : > { %2597 = vst.msk [vmem:[%s3760_s12 + $0xb0] sm:$0xff] %vm919_vm6, %v2565_v36  ;;  %v2466_v22 = vadd.f32 %v2420_v48, %v2321_v38 }
 0x383   : > { %v2502_v11 = vadd.f32 %v3745_v17, %v2466_v22 }
 0x385   : > { %v2534_v13 = vadd.f32 %v2848_v9, %v2502_v11  ;;  %v2228_v23 = vpop.f32.mrf.mxu3 }
 0x386   : > { %v2326_v34 = vadd.f32 %v2325_v10, %v2228_v23  ;;  %v2855_v10 = vld [vmem:[%s2914_s23 + $0xf0] sm:$0xff] }
 0x387   : > { %v2566_v39 = vmax.f32 %v2534_v13, 0.0  ;;  %v2333_v15 = vpop.f32.mrf.mxu0 }
 0x388   : > { %v2423_v51 = vpop.f32.mrf.mxu1 }
 0x389   : > { %2598 = vst.msk [vmem:[%s3760_s12 + $0xb8] sm:$0xff] %vm919_vm6, %v2566_v39  ;;  %v2467_v14 = vadd.f32 %v2423_v51, %v2324_v8 }
 0x38b   : > { %v2503_v63 = vadd.f32 %v3745_v17, %v2467_v14  ;;  %v2856_v14 = vld [vmem:[%s2914_s23 + $0xf8] sm:$0xff] }
 0x38d   : > { %v2535_v55 = vadd.f32 %v2849_v20, %v2503_v63  ;;  %v2231_v24 = vpop.f32.mrf.mxu3 }
 0x38e   : > { %v2329_v30 = vadd.f32 %v2328_v29, %v2231_v24 }
 0x38f   : > { %v2567_v16 = vmax.f32 %v2535_v55, 0.0  ;;  %v2335_v2 = vpop.f32.mrf.mxu0 }
 0x390   : > { %v2425_v59 = vpop.f32.mrf.mxu1 }
 0x391   : > { %2599 = vst.msk [vmem:[%s3760_s12 + $0xc0] sm:$0xff] %vm919_vm6, %v2567_v16  ;;  %v2468_v50 = vadd.f32 %v2425_v59, %v2326_v34 }
 0x393   : > { %v2504_v57 = vadd.f32 %v3745_v17, %v2468_v50 }
 0x395   : > { %v2536_v21 = vadd.f32 %v2850_v0, %v2504_v57  ;;  %v2233_v32 = vpop.f32.mrf.mxu3 }
 0x396   : > { %v2331_v40 = vadd.f32 %v2330_v49, %v2233_v32 }
 0x397   : > { %v2568_v61 = vmax.f32 %v2536_v21, 0.0  ;;  %v2338_v4 = vpop.f32.mrf.mxu0 }
 0x398   : > { %v2428_v28 = vpop.f32.mrf.mxu1 }
 0x399   : > { %2600 = vst.msk [vmem:[%s3760_s12 + $0xc8] sm:$0xff] %vm919_vm6, %v2568_v61  ;;  %v2469_v42 = vadd.f32 %v2428_v28, %v2329_v30 }
 0x39b   : > { %v2505_v56 = vadd.f32 %v3745_v17, %v2469_v42 }
 0x39d   : > { %v2537_v47 = vadd.f32 %v2851_v43, %v2505_v56  ;;  %v2236_v45 = vpop.f32.mrf.mxu3 }
 0x39e   : > { %v2334_v37 = vadd.f32 %v2333_v15, %v2236_v45 }
 0x39f   : > { %v2569_v41 = vmax.f32 %v2537_v47, 0.0  ;;  %v2340_v9 = vpop.f32.mrf.mxu0 }
 0x3a0   : > { %v2430_v52 = vpop.f32.mrf.mxu1 }
 0x3a1   : > { %2601 = vst.msk [vmem:[%s3760_s12 + $0xd0] sm:$0xff] %vm919_vm6, %v2569_v41  ;;  %v2470_v35 = vadd.f32 %v2430_v52, %v2331_v40 }
 0x3a3   : > { %v2506_v19 = vadd.f32 %v3745_v17, %v2470_v35 }
 0x3a5   : > { %v2538_v53 = vadd.f32 %v2852_v12, %v2506_v19  ;;  %v2238_v31 = vpop.f32.mrf.mxu3 }
 0x3a6   : > { %v2336_v18 = vadd.f32 %v2335_v2, %v2238_v31 }
 0x3a7   : > { %v2570_v5 = vmax.f32 %v2538_v53, 0.0 }
 0x3a8   : > { %v2433_v33 = vpop.f32.mrf.mxu1 }
 0x3a9   : > { %2602 = vst.msk [vmem:[%s3760_s12 + $0xd8] sm:$0xff] %vm919_vm6, %v2570_v5  ;;  %v2471_v44 = vadd.f32 %v2433_v33, %v2334_v37 }
 0x3ab   : > { %v2507_v26 = vadd.f32 %v3745_v17, %v2471_v44 }
 0x3ad   : > { %v2539_v7 = vadd.f32 %v2853_v54, %v2507_v26  ;;  %v2241_v46 = vpop.f32.mrf.mxu3 }
 0x3ae   : > { %v2339_v62 = vadd.f32 %v2338_v4, %v2241_v46 }
 0x3af   : > { %v2571_v27 = vmax.f32 %v2539_v7, 0.0 }
 0x3b0   : > { %v2435_v58 = vpop.f32.mrf.mxu1 }
 0x3b1   : > { %2603 = vst.msk [vmem:[%s3760_s12 + $0xe0] sm:$0xff] %vm919_vm6, %v2571_v27  ;;  %v2472_v1 = vadd.f32 %v2435_v58, %v2336_v18 }
 0x3b3   : > { %v2508_v3 = vadd.f32 %v3745_v17, %v2472_v1 }
 0x3b5   : > { %v2540_v25 = vadd.f32 %v2854_v6, %v2508_v3  ;;  %v2243_v22 = vpop.f32.mrf.mxu3 }
 0x3b6   : > { %v2341_v13 = vadd.f32 %v2340_v9, %v2243_v22 }
 0x3b7   : > { %v2572_v60 = vmax.f32 %v2540_v25, 0.0 }
 0x3b8   : > { %v2438_v38 = vpop.f32.mrf.mxu1 }
 0x3b9   : > { %2604 = vst.msk [vmem:[%s3760_s12 + $0xe8] sm:$0xff] %vm919_vm6, %v2572_v60  ;;  %v2473_v36 = vadd.f32 %v2438_v38, %v2339_v62 }
 0x3bb   : > { %v2509_v48 = vadd.f32 %v3745_v17, %v2473_v36 }
 0x3bd   : > { %v2541_v11 = vadd.f32 %v2855_v10, %v2509_v48 }
 0x3bf   : > { %v2573_v23 = vmax.f32 %v2541_v11, 0.0 }
 0x3c0   : > { %v2440_v8 = vpop.f32.mrf.mxu1 }
 0x3c1   : > { %2605 = vst.msk [vmem:[%s3760_s12 + $0xf0] sm:$0xff] %vm919_vm6, %v2573_v23  ;;  %v2474_v39 = vadd.f32 %v2440_v8, %v2341_v13 }
 0x3c3   : > { %v2510_v51 = vadd.f32 %v3745_v17, %v2474_v39 }
 0x3c5   : > { %v2542_v63 = vadd.f32 %v2856_v14, %v2510_v51 }
 0x3c7   : > { %v2574_v29 = vmax.f32 %v2542_v63, 0.0 }
 0x3c9   : > { %2606 = vst.msk [vmem:[%s3760_s12 + $0xf8] sm:$0xff] %vm919_vm6, %v2574_v29 }
 0x3ca PF: > { %s15_s18 = sadd.s32 1, %s2863_s18  }
 0x3cb   : > { %p12_p4 = scmp.ge.s32.totalorder %s15_s18, 4  }
 0x3cd   :  { %14 = sbr.rel (!%p12_p4) target bundleno = 1 (0x1), region = 74 }

</bundles_post_ra>
